<compile_context>
chip_gen: v6e
topology: v6e:2x2x1
jax: 0.10.0
libtpu: 0.0.40
codegen_flags: <defaults>
</compile_context>

<pallas_src>
import functools

import jax
import jax.numpy as jnp
from jax.experimental import pallas as pl
from jax.experimental.pallas import tpu as pltpu


# ----------------------------------------------------------------------------
# Fused kernel: both (conv3x3 + bias + activation + instance-norm) stages for a
# single batch element, in the width-folded (rows=H, lanes=C*W) layout.
# ----------------------------------------------------------------------------
def _unet_block_kernel(x_ref, w1_ref, b1_ref, g1_ref, bt1_ref, seg1_ref,
                       w2_ref, b2_ref, g2_ref, bt2_ref, seg2_ref,
                       o_ref, xp1_ref, xp2_ref,
                       *, padding, leaky, instance_norm, eps=1e-5):
    # x_ref   : (1, Cin, H, W)                      NCHW input image
    # wN_ref  : (3, Ci*Wi, Co*Wo)                   banded weights, one per dy
    # bN/gN/btN : (1, Co*Wo)                        channel-major folded vectors
    # segN_ref: (Co*Wo, Co*Wo)                      block-diag mean operator
    # o_ref   : (1, Cout, Ho2, Wo2)                 NCHW output image
    # xp1_ref : VMEM (H+2p,   Cin*W)                row-padded stage-1 input
    # xp2_ref : VMEM (Ho1+2p, Cmid*Wo1)             row-padded stage-1 output
    _, Cin, H, W = x_ref.shape
    _, Cout, Ho2, Wo2 = o_ref.shape
    p = padding
    Ho1 = H + 2 * p - 2

    def stage(xp_ref, w_ref, b_ref, g_ref, bt_ref, seg_ref, ho):
        # xp_ref: (ho + 2, Ci*Wi) row-padded, width-folded input (VMEM).
        # 3 lane-dense MXU dots (one per vertical tap), f32 accumulation;
        # horizontal taps + horizontal zero padding are inside w_ref already.
        acc = jnp.dot(xp_ref[pl.ds(0, ho), :], w_ref[0, :, :],
                      preferred_element_type=jnp.float32)
        for dy in (1, 2):
            acc = acc + jnp.dot(xp_ref[pl.ds(dy, ho), :], w_ref[dy, :, :],
                                preferred_element_type=jnp.float32)
        acc = acc + b_ref[...]                                 # (ho, Co*Wo)
        if leaky:                                              # nn.LeakyReLU(0.01)
            act = jnp.where(acc >= 0, acc, 0.01 * acc)
        else:                                                  # nn.ReLU
            act = jnp.maximum(acc, 0.0)
        if instance_norm:
            # Per-channel stats: sublane row-sum, then one block-diagonal
            # segment matmul that sums each channel's Wo-wide lane block and
            # broadcasts the result back (seg is pre-scaled by 1/(ho*wo)).
            # Two-pass (centered) variance to avoid cancellation.
            mean = jnp.dot(jnp.sum(act, axis=0, keepdims=True), seg_ref[...],
                           preferred_element_type=jnp.float32)  # (1, Co*Wo)
            cent = act - mean
            var = jnp.dot(jnp.sum(cent * cent, axis=0, keepdims=True),
                          seg_ref[...], preferred_element_type=jnp.float32)
            return cent * (g_ref[...] * jax.lax.rsqrt(var + eps)) + bt_ref[...]
        return act                                             # (ho, Co*Wo) f32

    # Zero only the vertical halo rows; re-zeroed every step so per-core
    # scratch stays correct when the "parallel" batch axis is split across
    # TensorCores (a core that never runs step 0 must not see stale halos).
    if p > 0:
        lanes1 = xp1_ref.shape[1]
        lanes2 = xp2_ref.shape[1]
        xp1_ref[pl.ds(0, p), :] = jnp.zeros((p, lanes1), xp1_ref.dtype)
        xp1_ref[pl.ds(H + p, p), :] = jnp.zeros((p, lanes1), xp1_ref.dtype)
        xp2_ref[pl.ds(0, p), :] = jnp.zeros((p, lanes2), xp2_ref.dtype)
        xp2_ref[pl.ds(Ho1 + p, p), :] = jnp.zeros((p, lanes2), xp2_ref.dtype)

    # ---- stage 1: fold NCHW -> (rows=H, lanes=Cin*W) with Cin small static
    #      stores (replaces the wrapper-side NCHW->NHWC HBM round trip).
    for ci in range(Cin):
        xp1_ref[pl.ds(p, H), pl.ds(ci * W, W)] = (
            x_ref[0, ci, :, :].astype(xp1_ref.dtype))
    h1 = stage(xp1_ref, w1_ref, b1_ref, g1_ref, bt1_ref, seg1_ref, Ho1)

    # ---- stage 2: stage-1 activations stay in VMEM; one full-width store.
    xp2_ref[pl.ds(p, Ho1), :] = h1.astype(xp2_ref.dtype)
    h2 = stage(xp2_ref, w2_ref, b2_ref, g2_ref, bt2_ref, seg2_ref, Ho2)

    # ---- store directly in NCHW (no wrapper transpose / extra HBM pass):
    #      per-channel lane blocks of the folded result.
    for co in range(Cout):
        o_ref[0, co, :, :] = h2[:, co * Wo2:(co + 1) * Wo2].astype(o_ref.dtype)


# ----------------------------------------------------------------------------
# Wrapper-side parameter preparation.
# ----------------------------------------------------------------------------
def _banded_weights(w_oihw, wi_n, wo_n, p, dtype):
    """(O, I, 3, 3) conv weights -> (3, I*wi_n, O*wo_n) banded matrices.

    big[dy, ci*wi_n + wi, co*wo_n + wo] = W[co, ci, dy, wi - wo + p]
    when 0 <= wi - wo + p < 3, else 0.  Horizontal taps and horizontal zero
    padding are thereby folded into the matmul; only vertical (row) padding is
    materialized in the kernel scratch.
    """
    co_n, ci_n, _, _ = w_oihw.shape
    wi = jnp.arange(wi_n)
    wo = jnp.arange(wo_n)
    dx = wi[:, None] - wo[None, :] + p                        # (wi_n, wo_n)
    valid = (dx >= 0) & (dx < 3)
    w_sel = jnp.take(w_oihw.astype(jnp.float32), jnp.clip(dx, 0, 2), axis=3)
    w_sel = jnp.where(valid[None, None, None], w_sel, 0.0)    # (co, ci, 3, wi, wo)
    big = jnp.transpose(w_sel, (2, 1, 3, 0, 4)).reshape(3, ci_n * wi_n,
                                                        co_n * wo_n)
    return big.astype(dtype)


def _vmem_limit_bytes():
    """Per-generation VMEM cap: ~3/4 of physical (≈48 MiB on v7x, ≈96 MiB on
    v5e/v6e); demo footprint is < 2 MiB, so this is just scheduler headroom."""
    try:
        cap = int(pltpu.get_tpu_info().vmem_capacity_bytes)
        return max(32 * 1024 * 1024, min(cap * 3 // 4, 112 * 1024 * 1024))
    except Exception:
        return 32 * 1024 * 1024


def unet_conv_block(x_nchw, params, *, padding, instance_norm, leaky,
                    compute_dtype=jnp.float32):
    # compute_dtype=jnp.bfloat16 is the recommended production setting on
    # v6e/v7x (bf16 MXU operands + halved scratch); f32 accumulation and f32
    # norm statistics are kept either way.  Default f32 keeps the 1e-4 check.
    N, Cin, H, W = x_nchw.shape
    Cmid = params["w1"].shape[0]
    Cout = params["w2"].shape[0]
    p = padding
    Ho1, Wo1 = H + 2 * p - 2, W + 2 * p - 2
    Ho2, Wo2 = Ho1 + 2 * p - 2, Wo1 + 2 * p - 2
    Hp1, Hp2 = H + 2 * p, Ho1 + 2 * p

    # TODO(synk): precompute the banded weights / folded vectors outside the
    #             step function for production (they are tiny: 96/192 KiB here).
    w1 = _banded_weights(params["w1"], W, Wo1, p, compute_dtype)
    w2 = _banded_weights(params["w2"], Wo1, Wo2, p, compute_dtype)

    def fold(v, wo):  # (C,) -> (1, C*wo), channel-major repeat
        return jnp.repeat(v.astype(jnp.float32), wo)[None, :]

    b1, g1, bt1 = (fold(params[k], Wo1) for k in ("b1", "g1", "bt1"))
    b2, g2, bt2 = (fold(params[k], Wo2) for k in ("b2", "g2", "bt2"))

    def seg(c, wo, ho):
        # Block-diagonal "sum each channel's wo-wide lane block and broadcast
        # back", pre-scaled by 1/(ho*wo): one lane-dense MXU matmul replaces
        # the lane-sparse per-channel reductions of the previous version.
        blk = jnp.arange(c * wo) // wo
        return (blk[:, None] == blk[None, :]).astype(jnp.float32) / float(ho * wo)

    seg1, seg2 = seg(Cmid, Wo1, Ho1), seg(Cout, Wo2, Ho2)

    kernel = functools.partial(_unet_block_kernel, padding=p, leaky=leaky,
                               instance_norm=instance_norm)

    out = pl.pallas_call(
        kernel,
        out_shape=jax.ShapeDtypeStruct((N, Cout, Ho2, Wo2), x_nchw.dtype),
        grid_spec=pltpu.PrefetchScalarGridSpec(
            num_scalar_prefetch=0,
            grid=(N,),
            in_specs=[
                pl.BlockSpec((1, Cin, H, W), lambda n: (n, 0, 0, 0)),
                pl.BlockSpec((3, Cin * W, Cmid * Wo1), lambda n: (0, 0, 0)),
                pl.BlockSpec((1, Cmid * Wo1), lambda n: (0, 0)),
                pl.BlockSpec((1, Cmid * Wo1), lambda n: (0, 0)),
                pl.BlockSpec((1, Cmid * Wo1), lambda n: (0, 0)),
                pl.BlockSpec((Cmid * Wo1, Cmid * Wo1), lambda n: (0, 0)),
                pl.BlockSpec((3, Cmid * Wo1, Cout * Wo2), lambda n: (0, 0, 0)),
                pl.BlockSpec((1, Cout * Wo2), lambda n: (0, 0)),
                pl.BlockSpec((1, Cout * Wo2), lambda n: (0, 0)),
                pl.BlockSpec((1, Cout * Wo2), lambda n: (0, 0)),
                pl.BlockSpec((Cout * Wo2, Cout * Wo2), lambda n: (0, 0)),
            ],
            out_specs=pl.BlockSpec((1, Cout, Ho2, Wo2), lambda n: (n, 0, 0, 0)),
            scratch_shapes=[
                pltpu.VMEM((Hp1, Cin * W), compute_dtype),      # row-padded in
                pltpu.VMEM((Hp2, Cmid * Wo1), compute_dtype),   # row-padded mid
            ],
        ),
        compiler_params=pltpu.CompilerParams(
            dimension_semantics=("parallel",),      # batch axis across TCs
            vmem_limit_bytes=_vmem_limit_bytes(),
        ),
    )(x_nchw, w1, b1, g1, bt1, seg1, w2, b2, g2, bt2, seg2)

    return out  # already NCHW: no wrapper transpose / reshape needed


# ----------------------------------------------------------------------------
# Pure-JAX reference (same math, via lax.conv) for verification.
# ----------------------------------------------------------------------------
def _ref_block(x, p, *, padding, instance_norm, leaky):
    def conv(x, w, b):
        y = jax.lax.conv_general_dilated(
            x, w, (1, 1), [(padding, padding)] * 2,
            dimension_numbers=("NCHW", "OIHW", "NCHW"))
        return y + b[None, :, None, None]

    def act(x):
        return jnp.where(x >= 0, x, 0.01 * x) if leaky else jnp.maximum(x, 0.0)

    def inorm(x, g, bt):
        mean = x.mean(axis=(2, 3), keepdims=True)
        var = ((x - mean) ** 2).mean(axis=(2, 3), keepdims=True)
        return (x - mean) * jax.lax.rsqrt(var + 1e-5) * g[None, :, None, None] \
            + bt[None, :, None, None]

    h = act(conv(x, p["w1"], p["b1"]))
    if instance_norm:
        h = inorm(h, p["g1"], p["bt1"])
    h = act(conv(h, p["w2"], p["b2"]))
    if instance_norm:
        h = inorm(h, p["g2"], p["bt2"])
    return h


def _init_params(key, in_size, out_size):
    ks = jax.random.split(key, 8)
    k1 = 1.0 / jnp.sqrt(in_size * 9.0)
    k2 = 1.0 / jnp.sqrt(out_size * 9.0)
    return {
        "w1": jax.random.uniform(ks[0], (out_size, in_size, 3, 3), jnp.float32, -k1, k1),
        "b1": jax.random.uniform(ks[1], (out_size,), jnp.float32, -k1, k1),
        "g1": jax.random.uniform(ks[2], (out_size,), jnp.float32, 0.5, 1.5),
        "bt1": jax.random.uniform(ks[3], (out_size,), jnp.float32, -0.5, 0.5),
        "w2": jax.random.uniform(ks[4], (out_size, out_size, 3, 3), jnp.float32, -k2, k2),
        "b2": jax.random.uniform(ks[5], (out_size,), jnp.float32, -k2, k2),
        "g2": jax.random.uniform(ks[6], (out_size,), jnp.float32, 0.5, 1.5),
        "bt2": jax.random.uniform(ks[7], (out_size,), jnp.float32, -0.5, 0.5),
    }


if __name__ == "__main__":
    # UNetConvBlock(in_size=4, out_size=8, padding=1, instance_norm=True, leaky=True)
    in_size, out_size, padding = 4, 8, 1
    N, H, W = 2, 16, 16

    key = jax.random.PRNGKey(0)
    kx, kp = jax.random.split(key)
    x = jax.random.normal(kx, (N, in_size, H, W), jnp.float32)
    params = _init_params(kp, in_size, out_size)

    # main config: LeakyReLU + InstanceNorm
    out = unet_conv_block(x, params, padding=padding, instance_norm=True, leaky=True)
    out = jax.block_until_ready(out)
    ref = _ref_block(x, params, padding=padding, instance_norm=True, leaky=True)
    assert out.shape == (N, out_size, H, W), out.shape
    assert jnp.allclose(out, ref, atol=1e-4, rtol=1e-4), \
        float(jnp.max(jnp.abs(out - ref)))

    # also exercise the ReLU / no-norm path
    out2 = unet_conv_block(x, params, padding=padding, instance_norm=False, leaky=False)
    out2 = jax.block_until_ready(out2)
    ref2 = _ref_block(x, params, padding=padding, instance_norm=False, leaky=False)
    assert jnp.allclose(out2, ref2, atol=1e-4, rtol=1e-4), \
        float(jnp.max(jnp.abs(out2 - ref2)))

    print("KERNEL_OK")
</pallas_src>

<mosaic_0001>
module attributes {stable_mosaic.version = 11 : i64} {
  func.func @_unet_block_kernel(%arg0: i32, %arg1: memref<1x4x16x16xf32, #tpu.memory_space<vmem>>, %arg2: memref<3x64x128xf32, #tpu.memory_space<vmem>>, %arg3: memref<1x128xf32, #tpu.memory_space<vmem>>, %arg4: memref<1x128xf32, #tpu.memory_space<vmem>>, %arg5: memref<1x128xf32, #tpu.memory_space<vmem>>, %arg6: memref<128x128xf32, #tpu.memory_space<vmem>>, %arg7: memref<3x128x128xf32, #tpu.memory_space<vmem>>, %arg8: memref<1x128xf32, #tpu.memory_space<vmem>>, %arg9: memref<1x128xf32, #tpu.memory_space<vmem>>, %arg10: memref<1x128xf32, #tpu.memory_space<vmem>>, %arg11: memref<128x128xf32, #tpu.memory_space<vmem>>, %arg12: memref<1x8x16x16xf32, #tpu.memory_space<vmem>>, %arg13: memref<18x64xf32, #tpu.memory_space<vmem>>, %arg14: memref<18x128xf32, #tpu.memory_space<vmem>>) attributes {dimension_semantics = [#tpu.dimension_semantics<parallel>], iteration_bounds = array<i64: 2>, scalar_prefetch = 0 : i64, scratch_operands = 2 : i64, tpu.core_type = #tpu.core_type<tc>, window_params = [{transform_indices = @transform_0, window_bounds = array<i64: 1, 4, 16, 16>}, {pipeline_mode = #tpu.pipeline_mode<synchronous>, transform_indices = @transform_1, window_bounds = array<i64: 3, 64, 128>}, {pipeline_mode = #tpu.pipeline_mode<synchronous>, transform_indices = @transform_2, window_bounds = array<i64: 1, 128>}, {pipeline_mode = #tpu.pipeline_mode<synchronous>, transform_indices = @transform_3, window_bounds = array<i64: 1, 128>}, {pipeline_mode = #tpu.pipeline_mode<synchronous>, transform_indices = @transform_4, window_bounds = array<i64: 1, 128>}, {pipeline_mode = #tpu.pipeline_mode<synchronous>, transform_indices = @transform_5, window_bounds = array<i64: 128, 128>}, {pipeline_mode = #tpu.pipeline_mode<synchronous>, transform_indices = @transform_6, window_bounds = array<i64: 3, 128, 128>}, {pipeline_mode = #tpu.pipeline_mode<synchronous>, transform_indices = @transform_7, window_bounds = array<i64: 1, 128>}, {pipeline_mode = #tpu.pipeline_mode<synchronous>, transform_indices = @transform_8, window_bounds = array<i64: 1, 128>}, {pipeline_mode = #tpu.pipeline_mode<synchronous>, transform_indices = @transform_9, window_bounds = array<i64: 1, 128>}, {pipeline_mode = #tpu.pipeline_mode<synchronous>, transform_indices = @transform_10, window_bounds = array<i64: 128, 128>}, {transform_indices = @transform_11, window_bounds = array<i64: 1, 8, 16, 16>}]} {
    %cst = arith.constant 0.000000e+00 : f32
    %0 = vector.broadcast %cst : f32 to vector<1x64xf32>
    %c0 = arith.constant 0 : index
    %c0_0 = arith.constant 0 : index
    %1 = vector.load %arg13[%c0, %c0_0] : memref<18x64xf32, #tpu.memory_space<vmem>>, vector<1x64xf32>
    tpu.vector_store %arg13[%c0, %c0_0], %0 {strides = array<i32>} : memref<18x64xf32, #tpu.memory_space<vmem>>, vector<1x64xf32>,
    %cst_1 = arith.constant 0.000000e+00 : f32
    %2 = vector.broadcast %cst_1 : f32 to vector<1x64xf32>
    %c17 = arith.constant 17 : index
    %c0_2 = arith.constant 0 : index
    %3 = vector.load %arg13[%c17, %c0_2] : memref<18x64xf32, #tpu.memory_space<vmem>>, vector<1x64xf32>
    tpu.vector_store %arg13[%c17, %c0_2], %2 {strides = array<i32>} : memref<18x64xf32, #tpu.memory_space<vmem>>, vector<1x64xf32>,
    %cst_3 = arith.constant 0.000000e+00 : f32
    %4 = vector.broadcast %cst_3 : f32 to vector<1x128xf32>
    %c0_4 = arith.constant 0 : index
    %c0_5 = arith.constant 0 : index
    %5 = vector.load %arg14[%c0_4, %c0_5] : memref<18x128xf32, #tpu.memory_space<vmem>>, vector<1x128xf32>
    tpu.vector_store %arg14[%c0_4, %c0_5], %4 {strides = array<i32>} : memref<18x128xf32, #tpu.memory_space<vmem>>, vector<1x128xf32>,
    %cst_6 = arith.constant 0.000000e+00 : f32
    %6 = vector.broadcast %cst_6 : f32 to vector<1x128xf32>
    %c17_7 = arith.constant 17 : index
    %c0_8 = arith.constant 0 : index
    %7 = vector.load %arg14[%c17_7, %c0_8] : memref<18x128xf32, #tpu.memory_space<vmem>>, vector<1x128xf32>
    tpu.vector_store %arg14[%c17_7, %c0_8], %6 {strides = array<i32>} : memref<18x128xf32, #tpu.memory_space<vmem>>, vector<1x128xf32>,
    %c0_9 = arith.constant 0 : index
    %c0_10 = arith.constant 0 : index
    %c0_11 = arith.constant 0 : index
    %c0_12 = arith.constant 0 : index
    %8 = vector.load %arg1[%c0_9, %c0_10, %c0_11, %c0_12] : memref<1x4x16x16xf32, #tpu.memory_space<vmem>>, vector<1x1x16x16xf32>
    %9 = vector.shape_cast %8 : vector<1x1x16x16xf32> to vector<16x16xf32>
    %c1 = arith.constant 1 : index
    %c0_13 = arith.constant 0 : index
    %10 = vector.load %arg13[%c1, %c0_13] : memref<18x64xf32, #tpu.memory_space<vmem>>, vector<16x16xf32>
    tpu.vector_store %arg13[%c1, %c0_13], %9 {strides = array<i32>} : memref<18x64xf32, #tpu.memory_space<vmem>>, vector<16x16xf32>,
    %c0_14 = arith.constant 0 : index
    %c1_15 = arith.constant 1 : index
    %c0_16 = arith.constant 0 : index
    %c0_17 = arith.constant 0 : index
    %11 = vector.load %arg1[%c0_14, %c1_15, %c0_16, %c0_17] : memref<1x4x16x16xf32, #tpu.memory_space<vmem>>, vector<1x1x16x16xf32>
    %12 = vector.shape_cast %11 : vector<1x1x16x16xf32> to vector<16x16xf32>
    %c1_18 = arith.constant 1 : index
    %c16 = arith.constant 16 : index
    %13 = vector.load %arg13[%c1_18, %c16] : memref<18x64xf32, #tpu.memory_space<vmem>>, vector<16x16xf32>
    tpu.vector_store %arg13[%c1_18, %c16], %12 {strides = array<i32>} : memref<18x64xf32, #tpu.memory_space<vmem>>, vector<16x16xf32>,
    %c0_19 = arith.constant 0 : index
    %c2 = arith.constant 2 : index
    %c0_20 = arith.constant 0 : index
    %c0_21 = arith.constant 0 : index
    %14 = vector.load %arg1[%c0_19, %c2, %c0_20, %c0_21] : memref<1x4x16x16xf32, #tpu.memory_space<vmem>>, vector<1x1x16x16xf32>
    %15 = vector.shape_cast %14 : vector<1x1x16x16xf32> to vector<16x16xf32>
    %c1_22 = arith.constant 1 : index
    %c32 = arith.constant 32 : index
    %16 = vector.load %arg13[%c1_22, %c32] : memref<18x64xf32, #tpu.memory_space<vmem>>, vector<16x16xf32>
    tpu.vector_store %arg13[%c1_22, %c32], %15 {strides = array<i32>} : memref<18x64xf32, #tpu.memory_space<vmem>>, vector<16x16xf32>,
    %c0_23 = arith.constant 0 : index
    %c3 = arith.constant 3 : index
    %c0_24 = arith.constant 0 : index
    %c0_25 = arith.constant 0 : index
    %17 = vector.load %arg1[%c0_23, %c3, %c0_24, %c0_25] : memref<1x4x16x16xf32, #tpu.memory_space<vmem>>, vector<1x1x16x16xf32>
    %18 = vector.shape_cast %17 : vector<1x1x16x16xf32> to vector<16x16xf32>
    %c1_26 = arith.constant 1 : index
    %c48 = arith.constant 48 : index
    %19 = vector.load %arg13[%c1_26, %c48] : memref<18x64xf32, #tpu.memory_space<vmem>>, vector<16x16xf32>
    tpu.vector_store %arg13[%c1_26, %c48], %18 {strides = array<i32>} : memref<18x64xf32, #tpu.memory_space<vmem>>, vector<16x16xf32>,
    %c0_27 = arith.constant 0 : index
    %c0_28 = arith.constant 0 : index
    %20 = vector.load %arg13[%c0_27, %c0_28] : memref<18x64xf32, #tpu.memory_space<vmem>>, vector<16x64xf32>
    %c0_29 = arith.constant 0 : index
    %c0_30 = arith.constant 0 : index
    %c0_31 = arith.constant 0 : index
    %21 = vector.load %arg2[%c0_29, %c0_30, %c0_31] : memref<3x64x128xf32, #tpu.memory_space<vmem>>, vector<1x64x128xf32>
    %22 = vector.shape_cast %21 : vector<1x64x128xf32> to vector<64x128xf32>
    %cst_32 = arith.constant dense<0.000000e+00> : vector<16x128xf32>
    %23 = tpu.matmul %20, %22, %cst_32 {dimension_numbers = #tpu.dot_dimension_numbers<[1], [0], [0], [1], [0, 0, 1, 1], [], []>} : vector<16x64xf32>, vector<64x128xf32>, vector<16x128xf32> -> vector<16x128xf32>
    %c1_33 = arith.constant 1 : index
    %c0_34 = arith.constant 0 : index
    %24 = vector.load %arg13[%c1_33, %c0_34] : memref<18x64xf32, #tpu.memory_space<vmem>>, vector<16x64xf32>
    %c1_35 = arith.constant 1 : index
    %c0_36 = arith.constant 0 : index
    %c0_37 = arith.constant 0 : index
    %25 = vector.load %arg2[%c1_35, %c0_36, %c0_37] : memref<3x64x128xf32, #tpu.memory_space<vmem>>, vector<1x64x128xf32>
    %26 = vector.shape_cast %25 : vector<1x64x128xf32> to vector<64x128xf32>
    %cst_38 = arith.constant dense<0.000000e+00> : vector<16x128xf32>
    %27 = tpu.matmul %24, %26, %cst_38 {dimension_numbers = #tpu.dot_dimension_numbers<[1], [0], [0], [1], [0, 0, 1, 1], [], []>} : vector<16x64xf32>, vector<64x128xf32>, vector<16x128xf32> -> vector<16x128xf32>
    %28 = arith.addf %23, %27 : vector<16x128xf32>
    %c2_39 = arith.constant 2 : index
    %c0_40 = arith.constant 0 : index
    %29 = vector.load %arg13[%c2_39, %c0_40] : memref<18x64xf32, #tpu.memory_space<vmem>>, vector<16x64xf32>
    %c2_41 = arith.constant 2 : index
    %c0_42 = arith.constant 0 : index
    %c0_43 = arith.constant 0 : index
    %30 = vector.load %arg2[%c2_41, %c0_42, %c0_43] : memref<3x64x128xf32, #tpu.memory_space<vmem>>, vector<1x64x128xf32>
    %31 = vector.shape_cast %30 : vector<1x64x128xf32> to vector<64x128xf32>
    %cst_44 = arith.constant dense<0.000000e+00> : vector<16x128xf32>
    %32 = tpu.matmul %29, %31, %cst_44 {dimension_numbers = #tpu.dot_dimension_numbers<[1], [0], [0], [1], [0, 0, 1, 1], [], []>} : vector<16x64xf32>, vector<64x128xf32>, vector<16x128xf32> -> vector<16x128xf32>
    %33 = arith.addf %28, %32 : vector<16x128xf32>
    %c0_45 = arith.constant 0 : index
    %c0_46 = arith.constant 0 : index
    %34 = vector.load %arg3[%c0_45, %c0_46] : memref<1x128xf32, #tpu.memory_space<vmem>>, vector<1x128xf32>
    %35 = vector.broadcast %34 : vector<1x128xf32> to vector<16x128xf32>
    %36 = arith.addf %33, %35 : vector<16x128xf32>
    %cst_47 = arith.constant 0.000000e+00 : f32
    %37 = vector.broadcast %cst_47 : f32 to vector<16x128xf32>
    %38 = arith.cmpf oge, %36, %37 : vector<16x128xf32>
    %cst_48 = arith.constant 0.00999999977 : f32
    %39 = vector.broadcast %cst_48 : f32 to vector<16x128xf32>
    %40 = arith.mulf %39, %36 : vector<16x128xf32>
    %41 = arith.select %38, %36, %40 : vector<16x128xi1>, vector<16x128xf32>
    %cst_49 = arith.constant dense<0.000000e+00> : vector<128xf32>
    %42 = vector.multi_reduction <add>, %41, %cst_49 [0] : vector<16x128xf32> to vector<128xf32>
    %43 = vector.shape_cast %42 : vector<128xf32> to vector<1x128xf32>
    %c0_50 = arith.constant 0 : index
    %c0_51 = arith.constant 0 : index
    %44 = vector.load %arg6[%c0_50, %c0_51] : memref<128x128xf32, #tpu.memory_space<vmem>>, vector<128x128xf32>
    %cst_52 = arith.constant dense<0.000000e+00> : vector<1x128xf32>
    %45 = tpu.matmul %43, %44, %cst_52 {dimension_numbers = #tpu.dot_dimension_numbers<[1], [0], [0], [1], [0, 0, 1, 1], [], []>} : vector<1x128xf32>, vector<128x128xf32>, vector<1x128xf32> -> vector<1x128xf32>
    %46 = vector.broadcast %45 : vector<1x128xf32> to vector<16x128xf32>
    %47 = arith.subf %41, %46 : vector<16x128xf32>
    %48 = arith.mulf %47, %47 : vector<16x128xf32>
    %cst_53 = arith.constant dense<0.000000e+00> : vector<128xf32>
    %49 = vector.multi_reduction <add>, %48, %cst_53 [0] : vector<16x128xf32> to vector<128xf32>
    %50 = vector.shape_cast %49 : vector<128xf32> to vector<1x128xf32>
    %c0_54 = arith.constant 0 : index
    %c0_55 = arith.constant 0 : index
    %51 = vector.load %arg6[%c0_54, %c0_55] : memref<128x128xf32, #tpu.memory_space<vmem>>, vector<128x128xf32>
    %cst_56 = arith.constant dense<0.000000e+00> : vector<1x128xf32>
    %52 = tpu.matmul %50, %51, %cst_56 {dimension_numbers = #tpu.dot_dimension_numbers<[1], [0], [0], [1], [0, 0, 1, 1], [], []>} : vector<1x128xf32>, vector<128x128xf32>, vector<1x128xf32> -> vector<1x128xf32>
    %c0_57 = arith.constant 0 : index
    %c0_58 = arith.constant 0 : index
    %53 = vector.load %arg4[%c0_57, %c0_58] : memref<1x128xf32, #tpu.memory_space<vmem>>, vector<1x128xf32>
    %cst_59 = arith.constant 9.99999974E-6 : f32
    %54 = vector.broadcast %cst_59 : f32 to vector<1x128xf32>
    %55 = arith.addf %52, %54 : vector<1x128xf32>
    %56 = math.rsqrt %55 : vector<1x128xf32>
    %57 = arith.mulf %53, %56 : vector<1x128xf32>
    %58 = vector.broadcast %57 : vector<1x128xf32> to vector<16x128xf32>
    %59 = arith.mulf %47, %58 : vector<16x128xf32>
    %c0_60 = arith.constant 0 : index
    %c0_61 = arith.constant 0 : index
    %60 = vector.load %arg5[%c0_60, %c0_61] : memref<1x128xf32, #tpu.memory_space<vmem>>, vector<1x128xf32>
    %61 = vector.broadcast %60 : vector<1x128xf32> to vector<16x128xf32>
    %62 = arith.addf %59, %61 : vector<16x128xf32>
    %c1_62 = arith.constant 1 : index
    %c0_63 = arith.constant 0 : index
    %63 = vector.load %arg14[%c1_62, %c0_63] : memref<18x128xf32, #tpu.memory_space<vmem>>, vector<16x128xf32>
    tpu.vector_store %arg14[%c1_62, %c0_63], %62 {strides = array<i32>} : memref<18x128xf32, #tpu.memory_space<vmem>>, vector<16x128xf32>,
    %c0_64 = arith.constant 0 : index
    %c0_65 = arith.constant 0 : index
    %64 = vector.load %arg14[%c0_64, %c0_65] : memref<18x128xf32, #tpu.memory_space<vmem>>, vector<16x128xf32>
    %c0_66 = arith.constant 0 : index
    %c0_67 = arith.constant 0 : index
    %c0_68 = arith.constant 0 : index
    %65 = vector.load %arg7[%c0_66, %c0_67, %c0_68] : memref<3x128x128xf32, #tpu.memory_space<vmem>>, vector<1x128x128xf32>
    %66 = vector.shape_cast %65 : vector<1x128x128xf32> to vector<128x128xf32>
    %cst_69 = arith.constant dense<0.000000e+00> : vector<16x128xf32>
    %67 = tpu.matmul %64, %66, %cst_69 {dimension_numbers = #tpu.dot_dimension_numbers<[1], [0], [0], [1], [0, 0, 1, 1], [], []>} : vector<16x128xf32>, vector<128x128xf32>, vector<16x128xf32> -> vector<16x128xf32>
    %c1_70 = arith.constant 1 : index
    %c0_71 = arith.constant 0 : index
    %68 = vector.load %arg14[%c1_70, %c0_71] : memref<18x128xf32, #tpu.memory_space<vmem>>, vector<16x128xf32>
    %c1_72 = arith.constant 1 : index
    %c0_73 = arith.constant 0 : index
    %c0_74 = arith.constant 0 : index
    %69 = vector.load %arg7[%c1_72, %c0_73, %c0_74] : memref<3x128x128xf32, #tpu.memory_space<vmem>>, vector<1x128x128xf32>
    %70 = vector.shape_cast %69 : vector<1x128x128xf32> to vector<128x128xf32>
    %cst_75 = arith.constant dense<0.000000e+00> : vector<16x128xf32>
    %71 = tpu.matmul %68, %70, %cst_75 {dimension_numbers = #tpu.dot_dimension_numbers<[1], [0], [0], [1], [0, 0, 1, 1], [], []>} : vector<16x128xf32>, vector<128x128xf32>, vector<16x128xf32> -> vector<16x128xf32>
    %72 = arith.addf %67, %71 : vector<16x128xf32>
    %c2_76 = arith.constant 2 : index
    %c0_77 = arith.constant 0 : index
    %73 = vector.load %arg14[%c2_76, %c0_77] : memref<18x128xf32, #tpu.memory_space<vmem>>, vector<16x128xf32>
    %c2_78 = arith.constant 2 : index
    %c0_79 = arith.constant 0 : index
    %c0_80 = arith.constant 0 : index
    %74 = vector.load %arg7[%c2_78, %c0_79, %c0_80] : memref<3x128x128xf32, #tpu.memory_space<vmem>>, vector<1x128x128xf32>
    %75 = vector.shape_cast %74 : vector<1x128x128xf32> to vector<128x128xf32>
    %cst_81 = arith.constant dense<0.000000e+00> : vector<16x128xf32>
    %76 = tpu.matmul %73, %75, %cst_81 {dimension_numbers = #tpu.dot_dimension_numbers<[1], [0], [0], [1], [0, 0, 1, 1], [], []>} : vector<16x128xf32>, vector<128x128xf32>, vector<16x128xf32> -> vector<16x128xf32>
    %77 = arith.addf %72, %76 : vector<16x128xf32>
    %c0_82 = arith.constant 0 : index
    %c0_83 = arith.constant 0 : index
    %78 = vector.load %arg8[%c0_82, %c0_83] : memref<1x128xf32, #tpu.memory_space<vmem>>, vector<1x128xf32>
    %79 = vector.broadcast %78 : vector<1x128xf32> to vector<16x128xf32>
    %80 = arith.addf %77, %79 : vector<16x128xf32>
    %cst_84 = arith.constant 0.000000e+00 : f32
    %81 = vector.broadcast %cst_84 : f32 to vector<16x128xf32>
    %82 = arith.cmpf oge, %80, %81 : vector<16x128xf32>
    %cst_85 = arith.constant 0.00999999977 : f32
    %83 = vector.broadcast %cst_85 : f32 to vector<16x128xf32>
    %84 = arith.mulf %83, %80 : vector<16x128xf32>
    %85 = arith.select %82, %80, %84 : vector<16x128xi1>, vector<16x128xf32>
    %cst_86 = arith.constant dense<0.000000e+00> : vector<128xf32>
    %86 = vector.multi_reduction <add>, %85, %cst_86 [0] : vector<16x128xf32> to vector<128xf32>
    %87 = vector.shape_cast %86 : vector<128xf32> to vector<1x128xf32>
    %c0_87 = arith.constant 0 : index
    %c0_88 = arith.constant 0 : index
    %88 = vector.load %arg11[%c0_87, %c0_88] : memref<128x128xf32, #tpu.memory_space<vmem>>, vector<128x128xf32>
    %cst_89 = arith.constant dense<0.000000e+00> : vector<1x128xf32>
    %89 = tpu.matmul %87, %88, %cst_89 {dimension_numbers = #tpu.dot_dimension_numbers<[1], [0], [0], [1], [0, 0, 1, 1], [], []>} : vector<1x128xf32>, vector<128x128xf32>, vector<1x128xf32> -> vector<1x128xf32>
    %90 = vector.broadcast %89 : vector<1x128xf32> to vector<16x128xf32>
    %91 = arith.subf %85, %90 : vector<16x128xf32>
    %92 = arith.mulf %91, %91 : vector<16x128xf32>
    %cst_90 = arith.constant dense<0.000000e+00> : vector<128xf32>
    %93 = vector.multi_reduction <add>, %92, %cst_90 [0] : vector<16x128xf32> to vector<128xf32>
    %94 = vector.shape_cast %93 : vector<128xf32> to vector<1x128xf32>
    %c0_91 = arith.constant 0 : index
    %c0_92 = arith.constant 0 : index
    %95 = vector.load %arg11[%c0_91, %c0_92] : memref<128x128xf32, #tpu.memory_space<vmem>>, vector<128x128xf32>
    %cst_93 = arith.constant dense<0.000000e+00> : vector<1x128xf32>
    %96 = tpu.matmul %94, %95, %cst_93 {dimension_numbers = #tpu.dot_dimension_numbers<[1], [0], [0], [1], [0, 0, 1, 1], [], []>} : vector<1x128xf32>, vector<128x128xf32>, vector<1x128xf32> -> vector<1x128xf32>
    %c0_94 = arith.constant 0 : index
    %c0_95 = arith.constant 0 : index
    %97 = vector.load %arg9[%c0_94, %c0_95] : memref<1x128xf32, #tpu.memory_space<vmem>>, vector<1x128xf32>
    %cst_96 = arith.constant 9.99999974E-6 : f32
    %98 = vector.broadcast %cst_96 : f32 to vector<1x128xf32>
    %99 = arith.addf %96, %98 : vector<1x128xf32>
    %100 = math.rsqrt %99 : vector<1x128xf32>
    %101 = arith.mulf %97, %100 : vector<1x128xf32>
    %102 = vector.broadcast %101 : vector<1x128xf32> to vector<16x128xf32>
    %103 = arith.mulf %91, %102 : vector<16x128xf32>
    %c0_97 = arith.constant 0 : index
    %c0_98 = arith.constant 0 : index
    %104 = vector.load %arg10[%c0_97, %c0_98] : memref<1x128xf32, #tpu.memory_space<vmem>>, vector<1x128xf32>
    %105 = vector.broadcast %104 : vector<1x128xf32> to vector<16x128xf32>
    %106 = arith.addf %103, %105 : vector<16x128xf32>
    %107 = vector.extract_strided_slice %106 {offsets = [0, 0], sizes = [16, 16], strides = [1, 1]} : vector<16x128xf32> to vector<16x16xf32>
    %c0_99 = arith.constant 0 : index
    %c0_100 = arith.constant 0 : index
    %c0_101 = arith.constant 0 : index
    %c0_102 = arith.constant 0 : index
    %108 = vector.load %arg12[%c0_99, %c0_100, %c0_101, %c0_102] : memref<1x8x16x16xf32, #tpu.memory_space<vmem>>, vector<1x1x16x16xf32>
    %109 = vector.shape_cast %108 : vector<1x1x16x16xf32> to vector<16x16xf32>
    %110 = vector.shape_cast %107 : vector<16x16xf32> to vector<1x1x16x16xf32>
    tpu.vector_store %arg12[%c0_99, %c0_100, %c0_101, %c0_102], %110 {strides = array<i32>} : memref<1x8x16x16xf32, #tpu.memory_space<vmem>>, vector<1x1x16x16xf32>,
    %111 = vector.extract_strided_slice %106 {offsets = [0, 16], sizes = [16, 16], strides = [1, 1]} : vector<16x128xf32> to vector<16x16xf32>
    %c0_103 = arith.constant 0 : index
    %c1_104 = arith.constant 1 : index
    %c0_105 = arith.constant 0 : index
    %c0_106 = arith.constant 0 : index
    %112 = vector.load %arg12[%c0_103, %c1_104, %c0_105, %c0_106] : memref<1x8x16x16xf32, #tpu.memory_space<vmem>>, vector<1x1x16x16xf32>
    %113 = vector.shape_cast %112 : vector<1x1x16x16xf32> to vector<16x16xf32>
    %114 = vector.shape_cast %111 : vector<16x16xf32> to vector<1x1x16x16xf32>
    tpu.vector_store %arg12[%c0_103, %c1_104, %c0_105, %c0_106], %114 {strides = array<i32>} : memref<1x8x16x16xf32, #tpu.memory_space<vmem>>, vector<1x1x16x16xf32>,
    %115 = vector.extract_strided_slice %106 {offsets = [0, 32], sizes = [16, 16], strides = [1, 1]} : vector<16x128xf32> to vector<16x16xf32>
    %c0_107 = arith.constant 0 : index
    %c2_108 = arith.constant 2 : index
    %c0_109 = arith.constant 0 : index
    %c0_110 = arith.constant 0 : index
    %116 = vector.load %arg12[%c0_107, %c2_108, %c0_109, %c0_110] : memref<1x8x16x16xf32, #tpu.memory_space<vmem>>, vector<1x1x16x16xf32>
    %117 = vector.shape_cast %116 : vector<1x1x16x16xf32> to vector<16x16xf32>
    %118 = vector.shape_cast %115 : vector<16x16xf32> to vector<1x1x16x16xf32>
    tpu.vector_store %arg12[%c0_107, %c2_108, %c0_109, %c0_110], %118 {strides = array<i32>} : memref<1x8x16x16xf32, #tpu.memory_space<vmem>>, vector<1x1x16x16xf32>,
    %119 = vector.extract_strided_slice %106 {offsets = [0, 48], sizes = [16, 16], strides = [1, 1]} : vector<16x128xf32> to vector<16x16xf32>
    %c0_111 = arith.constant 0 : index
    %c3_112 = arith.constant 3 : index
    %c0_113 = arith.constant 0 : index
    %c0_114 = arith.constant 0 : index
    %120 = vector.load %arg12[%c0_111, %c3_112, %c0_113, %c0_114] : memref<1x8x16x16xf32, #tpu.memory_space<vmem>>, vector<1x1x16x16xf32>
    %121 = vector.shape_cast %120 : vector<1x1x16x16xf32> to vector<16x16xf32>
    %122 = vector.shape_cast %119 : vector<16x16xf32> to vector<1x1x16x16xf32>
    tpu.vector_store %arg12[%c0_111, %c3_112, %c0_113, %c0_114], %122 {strides = array<i32>} : memref<1x8x16x16xf32, #tpu.memory_space<vmem>>, vector<1x1x16x16xf32>,
    %123 = vector.extract_strided_slice %106 {offsets = [0, 64], sizes = [16, 16], strides = [1, 1]} : vector<16x128xf32> to vector<16x16xf32>
    %c0_115 = arith.constant 0 : index
    %c4 = arith.constant 4 : index
    %c0_116 = arith.constant 0 : index
    %c0_117 = arith.constant 0 : index
    %124 = vector.load %arg12[%c0_115, %c4, %c0_116, %c0_117] : memref<1x8x16x16xf32, #tpu.memory_space<vmem>>, vector<1x1x16x16xf32>
    %125 = vector.shape_cast %124 : vector<1x1x16x16xf32> to vector<16x16xf32>
    %126 = vector.shape_cast %123 : vector<16x16xf32> to vector<1x1x16x16xf32>
    tpu.vector_store %arg12[%c0_115, %c4, %c0_116, %c0_117], %126 {strides = array<i32>} : memref<1x8x16x16xf32, #tpu.memory_space<vmem>>, vector<1x1x16x16xf32>,
    %127 = vector.extract_strided_slice %106 {offsets = [0, 80], sizes = [16, 16], strides = [1, 1]} : vector<16x128xf32> to vector<16x16xf32>
    %c0_118 = arith.constant 0 : index
    %c5 = arith.constant 5 : index
    %c0_119 = arith.constant 0 : index
    %c0_120 = arith.constant 0 : index
    %128 = vector.load %arg12[%c0_118, %c5, %c0_119, %c0_120] : memref<1x8x16x16xf32, #tpu.memory_space<vmem>>, vector<1x1x16x16xf32>
    %129 = vector.shape_cast %128 : vector<1x1x16x16xf32> to vector<16x16xf32>
    %130 = vector.shape_cast %127 : vector<16x16xf32> to vector<1x1x16x16xf32>
    tpu.vector_store %arg12[%c0_118, %c5, %c0_119, %c0_120], %130 {strides = array<i32>} : memref<1x8x16x16xf32, #tpu.memory_space<vmem>>, vector<1x1x16x16xf32>,
    %131 = vector.extract_strided_slice %106 {offsets = [0, 96], sizes = [16, 16], strides = [1, 1]} : vector<16x128xf32> to vector<16x16xf32>
    %c0_121 = arith.constant 0 : index
    %c6 = arith.constant 6 : index
    %c0_122 = arith.constant 0 : index
    %c0_123 = arith.constant 0 : index
    %132 = vector.load %arg12[%c0_121, %c6, %c0_122, %c0_123] : memref<1x8x16x16xf32, #tpu.memory_space<vmem>>, vector<1x1x16x16xf32>
    %133 = vector.shape_cast %132 : vector<1x1x16x16xf32> to vector<16x16xf32>
    %134 = vector.shape_cast %131 : vector<16x16xf32> to vector<1x1x16x16xf32>
    tpu.vector_store %arg12[%c0_121, %c6, %c0_122, %c0_123], %134 {strides = array<i32>} : memref<1x8x16x16xf32, #tpu.memory_space<vmem>>, vector<1x1x16x16xf32>,
    %135 = vector.extract_strided_slice %106 {offsets = [0, 112], sizes = [16, 16], strides = [1, 1]} : vector<16x128xf32> to vector<16x16xf32>
    %c0_124 = arith.constant 0 : index
    %c7 = arith.constant 7 : index
    %c0_125 = arith.constant 0 : index
    %c0_126 = arith.constant 0 : index
    %136 = vector.load %arg12[%c0_124, %c7, %c0_125, %c0_126] : memref<1x8x16x16xf32, #tpu.memory_space<vmem>>, vector<1x1x16x16xf32>
    %137 = vector.shape_cast %136 : vector<1x1x16x16xf32> to vector<16x16xf32>
    %138 = vector.shape_cast %135 : vector<16x16xf32> to vector<1x1x16x16xf32>
    tpu.vector_store %arg12[%c0_124, %c7, %c0_125, %c0_126], %138 {strides = array<i32>} : memref<1x8x16x16xf32, #tpu.memory_space<vmem>>, vector<1x1x16x16xf32>,
    return
  }
  func.func @transform_0(%arg0: i32) -> (i32, i32, i32, i32) {
    %c0_i32 = arith.constant 0 : i32
    %c0_i32_0 = arith.constant 0 : i32
    %c0_i32_1 = arith.constant 0 : i32
    %c0_i32_2 = arith.constant 0 : i32
    return %arg0, %c0_i32, %c0_i32_0, %c0_i32_1 : i32, i32, i32, i32
  }
  func.func @transform_1(%arg0: i32) -> (i32, i32, i32) {
    %c0_i32 = arith.constant 0 : i32
    %c0_i32_0 = arith.constant 0 : i32
    %c0_i32_1 = arith.constant 0 : i32
    %c0_i32_2 = arith.constant 0 : i32
    return %c0_i32, %c0_i32_0, %c0_i32_1 : i32, i32, i32
  }
  func.func @transform_2(%arg0: i32) -> (i32, i32) {
    %c0_i32 = arith.constant 0 : i32
    %c0_i32_0 = arith.constant 0 : i32
    %c0_i32_1 = arith.constant 0 : i32
    return %c0_i32, %c0_i32_0 : i32, i32
  }
  func.func @transform_3(%arg0: i32) -> (i32, i32) {
    %c0_i32 = arith.constant 0 : i32
    %c0_i32_0 = arith.constant 0 : i32
    %c0_i32_1 = arith.constant 0 : i32
    return %c0_i32, %c0_i32_0 : i32, i32
  }
  func.func @transform_4(%arg0: i32) -> (i32, i32) {
    %c0_i32 = arith.constant 0 : i32
    %c0_i32_0 = arith.constant 0 : i32
    %c0_i32_1 = arith.constant 0 : i32
    return %c0_i32, %c0_i32_0 : i32, i32
  }
  func.func @transform_5(%arg0: i32) -> (i32, i32) {
    %c0_i32 = arith.constant 0 : i32
    %c0_i32_0 = arith.constant 0 : i32
    %c0_i32_1 = arith.constant 0 : i32
    return %c0_i32, %c0_i32_0 : i32, i32
  }
  func.func @transform_6(%arg0: i32) -> (i32, i32, i32) {
    %c0_i32 = arith.constant 0 : i32
    %c0_i32_0 = arith.constant 0 : i32
    %c0_i32_1 = arith.constant 0 : i32
    %c0_i32_2 = arith.constant 0 : i32
    return %c0_i32, %c0_i32_0, %c0_i32_1 : i32, i32, i32
  }
  func.func @transform_7(%arg0: i32) -> (i32, i32) {
    %c0_i32 = arith.constant 0 : i32
    %c0_i32_0 = arith.constant 0 : i32
    %c0_i32_1 = arith.constant 0 : i32
    return %c0_i32, %c0_i32_0 : i32, i32
  }
  func.func @transform_8(%arg0: i32) -> (i32, i32) {
    %c0_i32 = arith.constant 0 : i32
    %c0_i32_0 = arith.constant 0 : i32
    %c0_i32_1 = arith.constant 0 : i32
    return %c0_i32, %c0_i32_0 : i32, i32
  }
  func.func @transform_9(%arg0: i32) -> (i32, i32) {
    %c0_i32 = arith.constant 0 : i32
    %c0_i32_0 = arith.constant 0 : i32
    %c0_i32_1 = arith.constant 0 : i32
    return %c0_i32, %c0_i32_0 : i32, i32
  }
  func.func @transform_10(%arg0: i32) -> (i32, i32) {
    %c0_i32 = arith.constant 0 : i32
    %c0_i32_0 = arith.constant 0 : i32
    %c0_i32_1 = arith.constant 0 : i32
    return %c0_i32, %c0_i32_0 : i32, i32
  }
  func.func @transform_11(%arg0: i32) -> (i32, i32, i32, i32) {
    %c0_i32 = arith.constant 0 : i32
    %c0_i32_0 = arith.constant 0 : i32
    %c0_i32_1 = arith.constant 0 : i32
    %c0_i32_2 = arith.constant 0 : i32
    return %arg0, %c0_i32, %c0_i32_0, %c0_i32_1 : i32, i32, i32, i32
  }
}

</mosaic_0001>

<bundles_post_ra>
// kernel: tpu_custom_call.1
= control target key start
LH: loop header
LB: loop body
LE: loop exit
PB: predicated region body
PF: predicated region fallthrough
CT: control target
= control target key end

     0   :  { %s2992_s0 = inlined_call_operand.hbm [shape: f32[2,4,16,16], index: 0, kind: input, shape index: {}]   ;;  %s2993_s1 = inlined_call_operand.hbm [shape: f32[3,64,128], index: 1, kind: input, shape index: {}]   ;;  %s2994_s2 = inlined_call_operand.vmem [shape: f32[1,128], index: 2, kind: input, shape index: {}]   ;;  %s2995_s3 = inlined_call_operand.vmem [shape: f32[1,128], index: 3, kind: input, shape index: {}]   ;;  %s2996_s4 = inlined_call_operand.vmem [shape: f32[1,128], index: 4, kind: input, shape index: {}]   ;;  %s2997_s5 = inlined_call_operand.hbm [shape: f32[128,128], index: 5, kind: input, shape index: {}]   ;;  %s2998_s6 = inlined_call_operand.hbm [shape: f32[3,128,128], index: 6, kind: input, shape index: {}]   ;;  %s2999_s7 = inlined_call_operand.vmem [shape: f32[1,128], index: 7, kind: input, shape index: {}]   ;;  %s3000_s8 = inlined_call_operand.vmem [shape: f32[1,128], index: 8, kind: input, shape index: {}]   ;;  %s3001_s9 = inlined_call_operand.vmem [shape: f32[1,128], index: 9, kind: input, shape index: {}]   ;;  %s3002_s10 = inlined_call_operand.hbm [shape: f32[128,128], index: 10, kind: input, shape index: {}]   ;;  %s3003_s11 = inlined_call_operand.hbm [shape: f32[2,8,16,16], index: 11, kind: output, shape index: {}]  }
   0x1   :  { %3010 = sst [smem:[#allocation19_spill]] %s2993_s1 }
   0x2   :  { %3011 = sst [smem:[#allocation20_spill]] %s2997_s5 }
   0x3   :  { %3012 = sst [smem:[#allocation21_spill]] %s2998_s6 }
   0x4   :  { %3013 = sst [smem:[#allocation22_spill]] %s3002_s10 }
   0x5   :  { %16 = vsyncpa [#allocation5], 0 }
   0x6   :  { %18 = vsyncpa [#allocation5 + $0x1], 0 }
   0x7   :  { %19 = vsyncpa [#allocation8], 0 }
   0x8   :  { %20 = vsyncpa [#allocation11], 0 }
   0x9   :  { %21 = vsyncpa [#allocation6], 0 }
   0xa   :  { %23 = vsyncpa [#allocation6 + $0x1], 0  ;;  %s2593_s17 = smov 0   ;;  %s2595_s18 = smov 0  }
   0xb   :  { %s2597_s19 = smov 0   ;;  %s2599_s20 = smov 0  }
   0xc LB: > { %s2614_s21 = sadd.s32 4294967295, %s2512_s20   ;;  %s1696_s22 = sadd.s32 4294967294, %s2512_s20   ;;  %s2512_s20 = sphi %s2599_s20, %s3040_s20   ;;  %s2508_s19 = sphi %s2597_s19, %s3039_s19   ;;  %s2504_s18 = sphi %s2595_s18, %s3038_s18   ;;  %s2500_s17 = sphi %s2593_s17, %s3037_s17  }
   0xd   : > { %p49_p0 = scmp.ne.s32.totalorder %s2504_s18, %s2500_s17  ;;  %p3004_p1 = scmp.eq.s32.totalorder %s2614_s21, 0 }
   0xe   : > { %p283_p2 = scmp.eq.s32.totalorder %s2614_s21, 1  ;;  %p289_p3 = scmp.eq.s32.totalorder %s1696_s22, 1 }
   0xf   : > { %p2623_p4 = por %p3004_p1, %p49_p0  ;;  %p1697_p5 = scmp.ge.s32.totalorder %s2512_s20, 1 }
  0x10   : > { %p2628_p6 = por %p289_p3, %p49_p0  ;;  %p296_p7 = scmp.lt.s32.totalorder %s2512_s20, 3 }
  0x11   : > { %s3014_s23 = scalar_select %p2623_p4, 1, 0 }
  0x12   : > { %s3015_s24 = scalar_select %p2628_p6, 1, 0 }
  0x13   : > { %p2633_p8 = pnand %p1697_p5, %p296_p7  ;;  %s2514_s26 = smov [#allocation7]  }
  0x14   : > { %s308_s27 = sshll.u32 %s2514_s26, 4  ;;  %s2515_s29 = smov [#allocation10]   ;;  %s309_s27 = int_to_ptr.vmem [resolvable:$true] %s308_s27 }
  0x15   : > { %s3016_s25 = scalar_select %p2633_p8, 1, 0 }
  0x16   : > { %p2224_p9 = pneg %p2633_p8  ;;  %s343_s30 = sshll.u32 %s2515_s29, 4  ;;  %s344_s30 = int_to_ptr.vmem [resolvable:$true] %s343_s30 }
  0x17   : > { %s2516_s12 = smov [#allocation9]   ;;  %s2319_s14 = scalar_lea.vmem %s309_s27, 3072 }
  0x18   : > { %p2642_p11 = pnand %p2224_p9, %p3004_p1  ;;  %s330_s13 = sshll.u32 %s2516_s12, 4  ;;  %s331_s13 = int_to_ptr.vmem [resolvable:$true] %s330_s13 }
  0x19   : > { %p2320_p13 = scmp.ne.s32.totalorder %s309_s27, %s2319_s14  ;;  %p2327_p5 = scmp.lt.s32.totalorder %s309_s27, %s309_s27 }
  0x1a   : > { %p2310_p12 = pneg %p2642_p11  ;;  %p2328_p7 = scmp.lt.s32.totalorder %s2319_s14, %s2319_s14 }
  0x1c   : > { %p2322_p0 = pnand %p2320_p13, %p2310_p12  ;;  %p2329_p9 = por %p2328_p7, %p2327_p5 }
  0x1e   : > { %p2323_p3 = pneg %p2322_p0 }
  0x20   : > { %p2330_p10 = pnand %p2329_p9, %p2323_p3 }
  0x22   : > { %2333 = shalt.err (!%p2330_p10)
}
  0x23   : > { %s3005_s15 = smov 128   ;;  %s3006_s16 = smov 8  }
  0x24   : > { %s3018_s1 = sld [smem:[#allocation19_spill]]  ;;  %s2345_s29 = scalar_lea.vmem %s344_s30, 6144 }
  0x25   : > { %p2346_p13 = scmp.ne.s32.totalorder %s344_s30, %s2345_s29  ;;  %p2353_p3 = scmp.lt.s32.totalorder %s344_s30, %s344_s30 }
  0x26   : > { %p2354_p10 = scmp.lt.s32.totalorder %s2345_s29, %s2345_s29 }
  0x27   : > { %p2348_p0 = pnand %p2346_p13, %p2310_p12 }
  0x28   : > { %p2355_p7 = por %p2354_p10, %p2353_p3 }
  0x29   : > { %p2349_p5 = pneg %p2348_p0 }
  0x2a   : > { %2227 = dma.hbm_to_vmem [thread:$0]  (!%p2642_p11), %s3018_s1, 3072, %s309_s27, [#allocation8], %s3005_s15, %s3005_s15, %s3006_s16  }
  0x2b   : > { %p2356_p9 = pnand %p2355_p7, %p2349_p5 }
  0x2d   : > { %2359 = shalt.err (!%p2356_p9)
}
  0x2e   : > { %s3019_s6 = sld [smem:[#allocation21_spill]]  ;;  %s2371_s27 = scalar_lea.vmem %s331_s13, 2048 }
  0x2f   : > { %p2372_p1 = scmp.ne.s32.totalorder %s331_s13, %s2371_s27  ;;  %p2379_p3 = scmp.lt.s32.totalorder %s331_s13, %s331_s13 }
  0x30   : > { %p2380_p5 = scmp.lt.s32.totalorder %s2371_s27, %s2371_s27 }
  0x31   : > { %p2374_p13 = pnand %p2372_p1, %p2310_p12 }
  0x32   : > { %p2381_p10 = por %p2380_p5, %p2379_p3 }
  0x33   : > { %p2375_p0 = pneg %p2374_p13 }
  0x34   : > { %2233 = dma.hbm_to_vmem [thread:$0]  (!%p2642_p11), %s3019_s6, 6144, %s344_s30, [#allocation11], %s3005_s15, %s3005_s15, %s3006_s16  }
  0x35   : > { %p2382_p7 = pnand %p2381_p10, %p2375_p0 }
  0x37   : > { %2385 = shalt.err (!%p2382_p7)
}
  0x38   : > { %s3020_s5 = sld [smem:[#allocation20_spill]]  ;;  %s2519_s30 = smov [#allocation12]  }
  0x39   : > { %s365_s29 = sshll.u32 %s2519_s30, 4  ;;  %s366_s29 = int_to_ptr.vmem [resolvable:$true] %s365_s29 }
  0x3a   : > { %s2397_s12 = scalar_lea.vmem %s366_s29, 2048  ;;  %p2405_p0 = scmp.lt.s32.totalorder %s366_s29, %s366_s29 }
  0x3b   : > { %p2398_p1 = scmp.ne.s32.totalorder %s366_s29, %s2397_s12  ;;  %p2406_p3 = scmp.lt.s32.totalorder %s2397_s12, %s2397_s12 }
  0x3d   : > { %p2400_p9 = pnand %p2398_p1, %p2310_p12  ;;  %p2407_p5 = por %p2406_p3, %p2405_p0 }
  0x3e   : > { %2230 = dma.hbm_to_vmem [thread:$0]  (!%p2642_p11), %s3020_s5, 2048, %s331_s13, [#allocation8], %s3005_s15, %s3005_s15, %s3006_s16  }
  0x3f   : > { %p2401_p13 = pneg %p2400_p9 }
  0x41   : > { %p2408_p10 = pnand %p2407_p5, %p2401_p13 }
  0x43   : > { %2411 = shalt.err (!%p2408_p10)
}
  0x44   : > { %s3021_s10 = sld [smem:[#allocation22_spill]]  ;;  %s2693_s27 = sadd.s32 1, %s2512_s20  }
  0x45   : > { %s36_s28 = sadd.s32 1, %s2508_s19  ;;  %s33_s22 = ssub.s32 %s2512_s20, %s2693_s27 }
  0x46   : > { %p43_p12 = scmp.ne.s32.totalorder %s2508_s19, %s2504_s18  ;;  %p34_p7 = scmp.eq.s32.totalorder %s33_s22, 0 }
  0x47   : > { %p44_p1 = scmp.eq.s32.totalorder %s2512_s20, 0  ;;  %p2249_p13 = scmp.lt.s32.totalorder %s2512_s20, 2 }
  0x48   : > { %p2703_p9 = por %p283_p2, %p43_p12  ;;  %s379_s12 = sand.u32 1, %s2508_s19  }
  0x49   : > { %s2709_s30 = scalar_select %p34_p7, %s2508_s19, %s36_s28  }
  0x4a   : > { %2236 = dma.hbm_to_vmem [thread:$0]  (!%p2642_p11), %s3021_s10, 2048, %s366_s29, [#allocation11], %s3005_s15, %s3005_s15, %s3006_s16  }
  0x4b   : > { %s3022_s26 = scalar_select %p2703_p9, 1, 0 }
  0x4c   : > { %3023 = sst [smem:[#allocation18_spill]] %s2709_s30  ;;  %p45_p0 = por %p44_p1, %p43_p12 }
  0x4d   : > { %s1703_s13 = sshll.u32 %s379_s12, 6  ;;  %s1748_s29 = sshll.u32 %s2512_s20, 10 }
  0x4e   : > { %s2716_s16 = scalar_lea.hbm %s2992_s0, %s1748_s29  ;;  %s383_s22 = scalar_lea.vmem [#allocation4], %s1703_s13 }
  0x4f   : > { %s390_s1 = sshll.u32 %s383_s22, 4  ;;  %p2720_p2 = pnand %p2249_p13, %p45_p0  ;;  %s2718_s1 = int_to_ptr.vmem [resolvable:$true] %s390_s1 }
  0x50   : > { %s2724_s28 = scalar_lea.sflag [#allocation5], %s379_s12  ;;  %s2412_s6 = scalar_lea.hbm %s2716_s16, 1024 }
  0x51   : > { %p2413_p11 = scmp.ne.s32.totalorder %s2716_s16, %s2412_s6  ;;  %p2414_p3 = pneg %p2720_p2 }
  0x52   : > { %s2417_s13 = scalar_lea.hbm %s2992_s0, 2048  ;;  %p2418_p12 = scmp.lt.s32.totalorder %s2716_s16, %s2992_s0 }
  0x53   : > { %p2415_p5 = pnand %p2414_p3, %p2413_p11  ;;  %p2419_p7 = scmp.lt.s32.totalorder %s2417_s13, %s2412_s6 }
  0x55   : > { %p2416_p10 = pneg %p2415_p5  ;;  %p2420_p1 = por %p2419_p7, %p2418_p12 }
  0x57   : > { %p2421_p13 = pnand %p2420_p1, %p2416_p10 }
  0x59   : > { %2424 = shalt.err (!%p2421_p13)
}
  0x5a   : > { %s2425_s12 = scalar_lea.vmem %s2718_s1, 1024  ;;  %s2520_s10 = smov [#allocation4]  }
  0x5b   : > { %p2426_p0 = scmp.ne.s32.totalorder %s2718_s1, %s2425_s12  ;;  %s2430_s30 = sshll.u32 %s2520_s10, 4  ;;  %s2431_s30 = int_to_ptr.vmem [resolvable:$false] %s2430_s30 }
  0x5c   : > { %s2432_s15 = scalar_lea.vmem %s2431_s30, 2048  ;;  %p2433_p5 = scmp.lt.s32.totalorder %s2718_s1, %s2431_s30 }
  0x5d   : > { %p2428_p6 = pnand %p2426_p0, %p2414_p3  ;;  %p2434_p9 = scmp.lt.s32.totalorder %s2432_s15, %s2425_s12 }
  0x5f   : > { %p2429_p11 = pneg %p2428_p6  ;;  %p2435_p4 = por %p2434_p9, %p2433_p5 }
  0x61   : > { %p2436_p8 = pnand %p2435_p4, %p2429_p11 }
  0x63   : > { %2439 = shalt.err (!%p2436_p8)
}
  0x64   : > { %s3025_s6 = smov 8   ;;  %s3026_s29 = smov 128  }
  0x65   : > { %2240 = dma.hbm_to_vmem [thread:$0]  (!%p2720_p2), %s2716_s16, 1024, %s2718_s1, %s2724_s28, %s3026_s29, %s3026_s29, %s3025_s6  }
  0x66   : > { %p3027_p6 = scmp.ne.s32.totalorder %s3016_s25, 0 }
  0x67   : > { %s2751_s10 = sand.u32 (!%p3027_p6), 1, %s2504_s18   ;;  %p3028_p4 = scmp.ne.s32.totalorder (!%p3027_p6), %s3014_s23, 0 }
  0x68   : > { %402 = sbr.rel (%p3027_p6) target bundleno = 1746 (0x6d2), region = 64  ;;  %s1707_s30 = sshll.u32 (!%p3027_p6), %s2751_s10, 6 }
  0x69   : > { %s405_s13 = scalar_lea.sflag (!%p3027_p6), [#allocation5], %s2751_s10  ;;  %s2755_s14 = scalar_lea.vmem (!%p3027_p6), [#allocation4], %s1707_s30 }
  0x6d   : > { %2483 = dma.done.wait (%p3028_p4), %s405_s13, 1024  }
  0x6e   : > { %2485 = vsyncadd (%p3028_p4), %s405_s13, 4294966272  ;;  %p3029_p8 = scmp.eq.s32.totalorder %s2614_s21, 0 }
  0x70   : > { %2487 = dma.done.wait (%p3029_p8), [#allocation8], 5120   ;;  %p3030_p9 = pmov %p3029_p8 }
  0x71   : > { %p3031_p2 = pmov %p3029_p8 }
  0x72   : > { %2489 = vsyncadd (%p3030_p9), [#allocation8], 4294962176 }
  0x73   : > { %2491 = dma.done.wait (%p3031_p2), [#allocation11], 8192   ;;  %p3032_p3 = pmov %p3031_p2 }
  0x74   : > { %vm463_vm0 = vcmask 516096   ;;  %v2521_v0 = vmov 0.0   ;;  %v1715_v1 = vld [vmem:[%s2755_s14 + $0x20] sm:$0xff]  ;;  %v1713_v2 = vld [vmem:[%s2755_s14 + $0x10] sm:$0xff]  ;;  %vm470_vm1 = vcmask 130048   ;;  %s2522_s1 = smov 32  }
  0x75   : > { %2493 = vsyncadd (%p3032_p3), [#allocation11], 4294959104  ;;  %464 = vst.msk [vmem:[#allocation2] sm:$0x1] %vm463_vm0, %v2521_v0  ;;  %492 = vrot.lane.b32.xlu1 %v1715_v1, %s2522_s1  ;;  %s2523_s5 = smov 16   ;;  %v1716_v3 = vld [vmem:[%s2755_s14 + $0x28] sm:$0xff] }
  0x76   : > { %465 = vst.msk [vmem:[#allocation2 + $0x11] sm:$0x1] %vm463_vm0, %v2521_v0  ;;  %466 = vst [vmem:[#allocation3] sm:$0x1] %v2521_v0  ;;  %478 = vrot.lane.b32.xlu0 %v1713_v2, %s2523_s5  ;;  %v535_v4 = vld [vmem:[#allocation7 + $0x78] sm:$0xff]  ;;  %v468_v6 = vld [vmem:[%s2755_s14] sm:$0xff] }
  0x77   : > { %467 = vst [vmem:[#allocation3 + $0x11] sm:$0x1] %v2521_v0  ;;  %v1714_v5 = vld [vmem:[%s2755_s14 + $0x18] sm:$0xff]  ;;  %1902 = vmatprep.subr.mxu0 %v535_v4  ;;  %471 = vst.msk [vmem:[#allocation2 + $0x1] sm:$0xff] %vm470_vm1, %v468_v6  ;;  %v534_v8 = vld [vmem:[#allocation7 + $0x70] sm:$0xff]  ;;  %s2524_s23 = smov 48  }
  0x78   : > { %v524_v7 = vld [vmem:[#allocation7 + $0x38] sm:$0xff]  ;;  %1903 = vmatpush3.msra.mxu0 %v535_v4  ;;  %v523_v9 = vld [vmem:[#allocation7 + $0x30] sm:$0xff]  ;;  %v469_v10 = vld [vmem:[%s2755_s14 + $0x8] sm:$0xff]  ;;  %vm484_vm2 = vcmask 261248   ;;  %vm498_vm3 = vcmask 392448   ;;  %vm512_vm4 = vcmask 523648  }
  0x79   : > { %1921 = vmatprep.subr.mxu1 %v524_v7  ;;  %1904 = vmatprep.subr.mxu0 %v534_v8  ;;  %472 = vst.msk [vmem:[#allocation2 + $0x9] sm:$0xff] %vm470_vm1, %v469_v10  ;;  %v533_v11 = vld [vmem:[#allocation7 + $0x68] sm:$0xff]  ;;  %v1718_v13 = vld [vmem:[%s2755_s14 + $0x38] sm:$0xff]  ;;  %v1717_v14 = vld [vmem:[%s2755_s14 + $0x30] sm:$0xff]  ;;  %vm536_vm5 = vcmask 523264   ;;  %vm2525_vm6 = vmmov 0  }
  0x7a   : > { %1922 = vmatpush3.msra.mxu1 %v524_v7  ;;  %494 = vrot.lane.b32.xlu1 %v1716_v3, %s2522_s1  ;;  %v522_v12 = vld [vmem:[#allocation7 + $0x28] sm:$0xff]  ;;  %v532_v15 = vld [vmem:[#allocation7 + $0x60] sm:$0xff]  ;;  %v531_v17 = vld [vmem:[#allocation7 + $0x58] sm:$0xff]  ;;  %s1712_s14 = sshll.u32 %s2751_s10, 7  ;;  %s2526_s22 = smov 112  }
  0x7b   : > { %480 = vrot.lane.b32.xlu0 %v1714_v5, %s2523_s5  ;;  %1905 = vmatpush3.msra.mxu0 %v534_v8  ;;  %v521_v16 = vld [vmem:[#allocation7 + $0x20] sm:$0xff]  ;;  %v520_v18 = vld [vmem:[#allocation7 + $0x18] sm:$0xff]  ;;  %v530_v19 = vld [vmem:[#allocation7 + $0x50] sm:$0xff]  ;;  %s2902_s28 = scalar_lea.vmem [#allocation13], %s1712_s14  ;;  %s2527_s12 = smov 96  }
  0x7c   : > { %1923 = vmatprep.subr.mxu1 %v523_v9  ;;  %1906 = vmatprep.subr.mxu0 %v533_v11  ;;  %v519_v20 = vld [vmem:[#allocation7 + $0x10] sm:$0xff]  ;;  %v529_v21 = vld [vmem:[#allocation7 + $0x48] sm:$0xff]  ;;  %v528_v23 = vld [vmem:[#allocation7 + $0x40] sm:$0xff]  ;;  %s2528_s15 = smov 80   ;;  %s2529_s6 = smov 64  }
  0x7d   : > { %1924 = vmatpush3.msra.mxu1 %v523_v9  ;;  %1907 = vmatpush3.msra.mxu0 %v533_v11  ;;  %v518_v22 = vld [vmem:[#allocation7 + $0x8] sm:$0xff]  ;;  %v517_v24 = vld [vmem:[#allocation7] sm:$0xff]  ;;  %v709_v25 = vld [vmem:[#allocation7 + $0xb8] sm:$0xff]  ;;  %p3033_p12 = scmp.ne.s32.totalorder %s3022_s26, 0  ;;  %s2530_s14 = smov [#allocation13]  }
  0x7e   : > { %1925 = vmatprep.subr.mxu1 %v522_v12  ;;  %508 = vrot.lane.b32.xlu1 %v1718_v13, %s2524_s23  ;;  %v708_v36 = vld [vmem:[#allocation7 + $0xb0] sm:$0xff]  ;;  %v707_v38 = vld [vmem:[#allocation7 + $0xa8] sm:$0xff]  ;;  %v706_v39 = vld [vmem:[#allocation7 + $0xa0] sm:$0xff]  ;;  %s2444_s25 = sshll.u32 %s2530_s14, 4  ;;  %s2445_s25 = int_to_ptr.vmem [resolvable:$false] %s2444_s25 }
  0x7f   : > { %506 = vrot.lane.b32.xlu0 %v1717_v14, %s2524_s23  ;;  %1908 = vmatprep.subr.mxu0 %v532_v15  ;;  %v705_v40 = vld [vmem:[#allocation7 + $0x98] sm:$0xff]  ;;  %v704_v41 = vld [vmem:[#allocation7 + $0x90] sm:$0xff]  ;;  %v703_v42 = vld [vmem:[#allocation7 + $0x88] sm:$0xff]  ;;  %s2446_s16 = scalar_lea.vmem %s2445_s25, 4096 }
  0x80   : > { %1926 = vmatpush3.msra.mxu1 %v522_v12  ;;  %1909 = vmatpush3.msra.mxu0 %v532_v15  ;;  %v702_v43 = vld [vmem:[#allocation7 + $0x80] sm:$0xff]  ;;  %v830_v45 = vld [vmem:[#allocation9 + $0x78] sm:$0xff]  ;;  %v829_v46 = vld [vmem:[#allocation9 + $0x70] sm:$0xff] }
  0x81   : > { %1927 = vmatprep.subr.mxu1 %v521_v16  ;;  %1910 = vmatprep.subr.mxu0 %v531_v17  ;;  %v828_v47 = vld [vmem:[#allocation9 + $0x68] sm:$0xff]  ;;  %v827_v48 = vld [vmem:[#allocation9 + $0x60] sm:$0xff]  ;;  %v826_v49 = vld [vmem:[#allocation9 + $0x58] sm:$0xff] }
  0x82   : > { %1928 = vmatpush3.msra.mxu1 %v521_v16  ;;  %1911 = vmatpush3.msra.mxu0 %v531_v17  ;;  %v825_v50 = vld [vmem:[#allocation9 + $0x50] sm:$0xff]  ;;  %v824_v51 = vld [vmem:[#allocation9 + $0x48] sm:$0xff]  ;;  %v823_v52 = vld [vmem:[#allocation9 + $0x40] sm:$0xff] }
  0x83   : > { %1929 = vmatprep.subr.mxu1 %v520_v18  ;;  %1912 = vmatprep.subr.mxu0 %v530_v19  ;;  %v822_v53 = vld [vmem:[#allocation9 + $0x38] sm:$0xff]  ;;  %v821_v54 = vld [vmem:[#allocation9 + $0x30] sm:$0xff]  ;;  %v820_v55 = vld [vmem:[#allocation9 + $0x28] sm:$0xff] }
  0x84   : > { %1930 = vmatpush3.msra.mxu1 %v520_v18  ;;  %1913 = vmatpush3.msra.mxu0 %v530_v19  ;;  %v819_v56 = vld [vmem:[#allocation9 + $0x20] sm:$0xff]  ;;  %v818_v57 = vld [vmem:[#allocation9 + $0x18] sm:$0xff]  ;;  %v817_v58 = vld [vmem:[#allocation9 + $0x10] sm:$0xff] }
  0x85   : > { %1931 = vmatprep.subr.mxu1 %v519_v20  ;;  %1914 = vmatprep.subr.mxu0 %v529_v21  ;;  %v816_v59 = vld [vmem:[#allocation9 + $0x8] sm:$0xff]  ;;  %v815_v60 = vld [vmem:[#allocation9] sm:$0xff]  ;;  %v1725_v4 = vld [vmem:[%s2994_s2] ss:$0 sm:$0xff] }
  0x86   : > { %1932 = vmatpush3.msra.mxu1 %v519_v20  ;;  %1915 = vmatpush3.msra.mxu0 %v529_v21 }
  0x87   : > { %1933 = vmatprep.subr.mxu1 %v518_v22  ;;  %1916 = vmatprep.subr.mxu0 %v528_v23 }
  0x88   : > { %1934 = vmatpush3.msra.mxu1 %v518_v22  ;;  %1917 = vmatpush3.msra.mxu0 %v528_v23  ;;  %v901_v22 = vlaneseq }
  0x89   : > { %1935 = vmatprep.subr.mxu1 %v517_v24  ;;  %1940 = vmatprep.subr.mxu0 %v709_v25 }
  0x8a   : > { %1936 = vmatpush3.msra.mxu1 %v517_v24  ;;  %v902_v23 = vshrl.u32 %v901_v22, 7  ;;  %v1211_v22 = vld [vmem:[#allocation10 + $0x168] sm:$0xff] }
  0x8b   : > { %1959 = vmatprep.subr.mxu1 %v2521_v0 }
  0x8c   : > { %v2834_v24 = vsub.s32 0, %v902_v23  ;;  %v1210_v23 = vld [vmem:[#allocation10 + $0x160] sm:$0xff] }
  0xe7   : > { %v493_v26 = vpop.permute.xlu1 %492 }
  0xe8   : > { %v479_v27 = vpop.permute.xlu0 %478 }
  0xe9   : > { %485 = vst.msk [vmem:[#allocation2 + $0x1] sm:$0xff] %vm484_vm2, %v479_v27 }
  0xea   : > { %499 = vst.msk [vmem:[#allocation2 + $0x1] sm:$0xff] %vm498_vm3, %v493_v26 }
  0xec   : > { %v495_v28 = vpop.permute.xlu1 %494 }
  0xed   : > { %v481_v29 = vpop.permute.xlu0 %480 }
  0xee   : > { %486 = vst.msk [vmem:[#allocation2 + $0x9] sm:$0xff] %vm484_vm2, %v481_v29 }
  0xef   : > { %500 = vst.msk [vmem:[#allocation2 + $0x9] sm:$0xff] %vm498_vm3, %v495_v28 }
  0xf0   : > { %v509_v30 = vpop.permute.xlu1 %508 }
  0xf1   : > { %v507_v31 = vpop.permute.xlu0 %506  ;;  %514 = vst.msk [vmem:[#allocation2 + $0x9] sm:$0xff] %vm512_vm4, %v509_v30 }
  0xf2   : > { %513 = vst.msk [vmem:[#allocation2 + $0x1] sm:$0xff] %vm512_vm4, %v507_v31 }
  0xf8   : > { %v526_v34 = vld [vmem:[#allocation2 + $0x9] sm:$0xff] }
  0xf9   : > { %v525_v32 = vld [vmem:[#allocation2 + $0x1] sm:$0xff]  ;;  %v700_v44 = vld [vmem:[#allocation2 + $0xa] sm:$0xff] }
  0xfa   : > { %v515_v33 = vld [vmem:[#allocation2] sm:$0xff]  ;;  %1918 = vmatprep.mubr.msk.f32.mxu0 %vm536_vm5, %v525_v32  ;;  %v516_v35 = vld [vmem:[#allocation2 + $0x8] sm:$0xff] }
  0xfb   : > { %1937 = vmatprep.mubr.msk.f32.mxu1 %vm536_vm5, %v515_v33  ;;  %1919 = vmatmul.mubr.msk.f32.vlgmr.msra.gmra.mxu0 %vm536_vm5, %v526_v34  ;;  %v699_v37 = vld [vmem:[#allocation2 + $0x2] sm:$0xff] }
  0xfc   : > { %1938 = vmatmul.mubr.msk.f32.vlgmr.msra.gmra.mxu1 %vm536_vm5, %v516_v35  ;;  %1941 = vmatpush3.msra.mxu0 %v709_v25 }
  0xfd   : > { %1956 = vmatprep.mubr.msk.f32.mxu0 %vm536_vm5, %v699_v37  ;;  %1942 = vmatprep.subr.mxu0 %v708_v36 }
  0xfe   : > { %1943 = vmatpush3.msra.mxu0 %v708_v36  ;;  %1960 = vmatpush3.msra.mxu1 %v830_v45 }
  0xff   : > { %1944 = vmatprep.subr.mxu0 %v707_v38  ;;  %1961 = vmatprep.subr.mxu1 %v2521_v0 }
 0x100   : > { %1945 = vmatpush3.msra.mxu0 %v707_v38  ;;  %1962 = vmatpush3.msra.mxu1 %v829_v46 }
 0x101   : > { %1946 = vmatprep.subr.mxu0 %v706_v39  ;;  %1963 = vmatprep.subr.mxu1 %v2521_v0 }
 0x102   : > { %1947 = vmatpush3.msra.mxu0 %v706_v39  ;;  %1964 = vmatpush3.msra.mxu1 %v828_v47  ;;  %v1044_v39 = vld [vmem:[#allocation10 + $0xf8] sm:$0xff] }
 0x103   : > { %1948 = vmatprep.subr.mxu0 %v705_v40  ;;  %1965 = vmatprep.subr.mxu1 %v2521_v0 }
 0x104   : > { %1949 = vmatpush3.msra.mxu0 %v705_v40  ;;  %1966 = vmatpush3.msra.mxu1 %v827_v48  ;;  %v1043_v40 = vld [vmem:[#allocation10 + $0xf0] sm:$0xff] }
 0x105   : > { %1950 = vmatprep.subr.mxu0 %v704_v41  ;;  %1967 = vmatprep.subr.mxu1 %v2521_v0 }
 0x106   : > { %1951 = vmatpush3.msra.mxu0 %v704_v41  ;;  %1968 = vmatpush3.msra.mxu1 %v826_v49  ;;  %v1042_v41 = vld [vmem:[#allocation10 + $0xe8] sm:$0xff] }
 0x107   : > { %1952 = vmatprep.subr.mxu0 %v703_v42  ;;  %1969 = vmatprep.subr.mxu1 %v2521_v0 }
 0x108   : > { %1953 = vmatpush3.msra.mxu0 %v703_v42  ;;  %1970 = vmatpush3.msra.mxu1 %v825_v50  ;;  %v1041_v42 = vld [vmem:[#allocation10 + $0xe0] sm:$0xff] }
 0x109   : > { %1954 = vmatprep.subr.mxu0 %v702_v43  ;;  %1971 = vmatprep.subr.mxu1 %v2521_v0 }
 0x10a   : > { %1955 = vmatpush3.msra.mxu0 %v702_v43  ;;  %1972 = vmatpush3.msra.mxu1 %v824_v51  ;;  %v1040_v43 = vld [vmem:[#allocation10 + $0xd8] sm:$0xff] }
 0x10b   : > { %1957 = vmatmul.mubr.msk.f32.vlgmr.msra.gmra.mxu0 %vm536_vm5, %v700_v44  ;;  %1994 = vmatprep.subr.mxu0 %v2521_v0  ;;  %v1025_v44 = vld [vmem:[#allocation10 + $0x78] sm:$0xff] }
 0x10c   : > { %1995 = vmatpush3.msra.mxu0 %v830_v45  ;;  %1973 = vmatprep.subr.mxu1 %v2521_v0  ;;  %v1039_v45 = vld [vmem:[#allocation10 + $0xd0] sm:$0xff] }
 0x10d   : > { %1996 = vmatprep.subr.mxu0 %v2521_v0  ;;  %1974 = vmatpush3.msra.mxu1 %v823_v52 }
 0x10e   : > { %1997 = vmatpush3.msra.mxu0 %v829_v46  ;;  %1975 = vmatprep.subr.mxu1 %v2521_v0  ;;  %v1024_v46 = vld [vmem:[#allocation10 + $0x70] sm:$0xff] }
 0x10f   : > { %1998 = vmatprep.subr.mxu0 %v2521_v0  ;;  %1976 = vmatpush3.msra.mxu1 %v822_v53 }
 0x110   : > { %1999 = vmatpush3.msra.mxu0 %v828_v47  ;;  %1977 = vmatprep.subr.mxu1 %v2521_v0  ;;  %v1038_v47 = vld [vmem:[#allocation10 + $0xc8] sm:$0xff] }
 0x111   : > { %2000 = vmatprep.subr.mxu0 %v2521_v0  ;;  %1978 = vmatpush3.msra.mxu1 %v821_v54 }
 0x112   : > { %2001 = vmatpush3.msra.mxu0 %v827_v48  ;;  %1979 = vmatprep.subr.mxu1 %v2521_v0  ;;  %v1023_v48 = vld [vmem:[#allocation10 + $0x68] sm:$0xff] }
 0x113   : > { %2002 = vmatprep.subr.mxu0 %v2521_v0  ;;  %1980 = vmatpush3.msra.mxu1 %v820_v55 }
 0x114   : > { %2003 = vmatpush3.msra.mxu0 %v826_v49  ;;  %1981 = vmatprep.subr.mxu1 %v2521_v0  ;;  %v1037_v49 = vld [vmem:[#allocation10 + $0xc0] sm:$0xff] }
 0x115   : > { %2004 = vmatprep.subr.mxu0 %v2521_v0  ;;  %1982 = vmatpush3.msra.mxu1 %v819_v56 }
 0x116   : > { %2005 = vmatpush3.msra.mxu0 %v825_v50  ;;  %1991 = vmatprep.mubr.msk.f32.mxu1 %vm2525_vm6, %v2521_v0  ;;  %v1022_v50 = vld [vmem:[#allocation10 + $0x60] sm:$0xff] }
 0x117   : > { %2006 = vmatprep.subr.mxu0 %v2521_v0  ;;  %1983 = vmatprep.subr.mxu1 %v2521_v0 }
 0x118   : > { %2007 = vmatpush3.msra.mxu0 %v824_v51  ;;  %1984 = vmatpush3.msra.mxu1 %v818_v57  ;;  %v1036_v51 = vld [vmem:[#allocation10 + $0xb8] sm:$0xff] }
 0x119   : > { %2008 = vmatprep.subr.mxu0 %v2521_v0  ;;  %1985 = vmatprep.subr.mxu1 %v2521_v0 }
 0x11a   : > { %2009 = vmatpush3.msra.mxu0 %v823_v52  ;;  %1986 = vmatpush3.msra.mxu1 %v817_v58  ;;  %v1021_v52 = vld [vmem:[#allocation10 + $0x58] sm:$0xff] }
 0x11b   : > { %2010 = vmatprep.subr.mxu0 %v2521_v0  ;;  %1987 = vmatprep.subr.mxu1 %v2521_v0 }
 0x11c   : > { %2011 = vmatpush3.msra.mxu0 %v822_v53  ;;  %1988 = vmatpush3.msra.mxu1 %v816_v59  ;;  %v1035_v53 = vld [vmem:[#allocation10 + $0xb0] sm:$0xff] }
 0x11d   : > { %2012 = vmatprep.subr.mxu0 %v2521_v0  ;;  %1989 = vmatprep.subr.mxu1 %v2521_v0 }
 0x11e   : > { %2013 = vmatpush3.msra.mxu0 %v821_v54  ;;  %1990 = vmatpush3.msra.mxu1 %v815_v60  ;;  %v1020_v54 = vld [vmem:[#allocation10 + $0x50] sm:$0xff] }
 0x11f   : > { %2014 = vmatprep.subr.mxu0 %v2521_v0  ;;  %2026 = vmatprep.mubr.msk.f32.mxu0 %vm2525_vm6, %v2521_v0 }
 0x120   : > { %2015 = vmatpush3.msra.mxu0 %v820_v55  ;;  %2029 = vmatprep.subr.mxu1 %v1044_v39  ;;  %v1034_v55 = vld [vmem:[#allocation10 + $0xa8] sm:$0xff] }
 0x121   : > { %2016 = vmatprep.subr.mxu0 %v2521_v0 }
 0x122   : > { %2017 = vmatpush3.msra.mxu0 %v819_v56  ;;  %v1019_v56 = vld [vmem:[#allocation10 + $0x48] sm:$0xff] }
 0x123   : > { %2018 = vmatprep.subr.mxu0 %v2521_v0 }
 0x124   : > { %2019 = vmatpush3.msra.mxu0 %v818_v57  ;;  %v1033_v57 = vld [vmem:[#allocation10 + $0xa0] sm:$0xff] }
 0x125   : > { %2020 = vmatprep.subr.mxu0 %v2521_v0 }
 0x126   : > { %2021 = vmatpush3.msra.mxu0 %v817_v58  ;;  %v1018_v58 = vld [vmem:[#allocation10 + $0x40] sm:$0xff] }
 0x127   : > { %2022 = vmatprep.subr.mxu0 %v2521_v0 }
 0x128   : > { %2023 = vmatpush3.msra.mxu0 %v816_v59  ;;  %v1032_v59 = vld [vmem:[#allocation10 + $0x98] sm:$0xff] }
 0x129   : > { %2024 = vmatprep.subr.mxu0 %v2521_v0 }
 0x12a   : > { %2025 = vmatpush3.msra.mxu0 %v815_v60  ;;  %v1017_v60 = vld [vmem:[#allocation10 + $0x38] sm:$0xff] }
 0x12b   : > { %2064 = vmatprep.subr.mxu0 %v1025_v44 }
 0x1bb   : > { %v1920_v61 = vpop.f32.mrf.mxu0 }
 0x1bc   : > { %v1939_v62 = vpop.f32.mrf.mxu1 }
 0x1bd   : > { %v609_v63 = vpop.f32.mrf.mxu0  ;;  %v696_v2 = vadd.f32 %v1939_v62, %v1920_v61  ;;  %v1031_v61 = vld [vmem:[#allocation10 + $0x90] sm:$0xff] }
 0x1be   : > { %v690_v1 = vpop.f32.mrf.mxu1  ;;  %v1016_v62 = vld [vmem:[#allocation10 + $0x30] sm:$0xff] }
 0x1bf   : > { %v691_v5 = vadd.f32 %v690_v1, %v609_v63  ;;  %v1030_v63 = vld [vmem:[#allocation10 + $0x88] sm:$0xff] }
 0x1c0   : > { %v1015_v1 = vld [vmem:[#allocation10 + $0x28] sm:$0xff] }
 0x1cb   : > { %v1958_v3 = vpop.f32.mrf.mxu0 }
 0x1cc   : > { %v792_v6 = vadd.f32 %v1958_v3, %v696_v2  ;;  %v1029_v2 = vld [vmem:[#allocation10 + $0x80] sm:$0xff] }
 0x1cd   : > { %v782_v7 = vpop.f32.mrf.mxu0  ;;  %v1014_v3 = vld [vmem:[#allocation10 + $0x20] sm:$0xff] }
 0x1ce   : > { %v801_v8 = vadd.f32 %v1725_v4, %v792_v6  ;;  %v791_v9 = vadd.f32 %v782_v7, %v691_v5  ;;  %v1013_v5 = vld [vmem:[#allocation10 + $0x18] sm:$0xff]  ;;  %v1012_v6 = vld [vmem:[#allocation10 + $0x10] sm:$0xff]  ;;  %v1011_v7 = vld [vmem:[#allocation10 + $0x8] sm:$0xff] }
 0x1d0   : > { %v805_v10 = vmul.f32 0.01, %v801_v8  ;;  %v800_v11 = vadd.f32 %v1725_v4, %v791_v9  ;;  %vm803_vm7 = vcmp.ge.f32.partialorder %v801_v8, 0.0  ;;  %v1213_v4 = vld [vmem:[#allocation10 + $0x178] sm:$0xff] }
 0x1d2   : > { %vm802_vm8 = vcmp.ge.f32.partialorder %v800_v11, 0.0  ;;  %v804_v12 = vmul.f32 0.01, %v800_v11  ;;  %v807_v13 = vsel %vm803_vm7, %v801_v8, %v805_v10  ;;  %v1010_v8 = vld [vmem:[#allocation10] sm:$0xff] }
 0x1d4   : > { %v806_v14 = vsel %vm802_vm8, %v800_v11, %v804_v12  ;;  %v916_v12 = vld [vmem:[%s2995_s3] sm:$0x1] }
 0x1d5   : > { %v808_v15 = vadd.f32 %v807_v13, %v806_v14 }
 0x1d7   : > { %v809_v16 = vrot.slane %v808_v15, 4 }
 0x1d9   : > { %v810_v17 = vadd.f32 %v809_v16, %v808_v15  ;;  %v1726_v16 = vld [vmem:[%s2996_s4] ss:$0 sm:$0xff] }
 0x1db   : > { %v811_v18 = vrot.slane %v810_v17, 2 }
 0x1dd   : > { %v812_v19 = vadd.f32 %v811_v18, %v810_v17 }
 0x1df   : > { %v813_v20 = vrot.slane %v812_v19, 1 }
 0x1e1   : > { %v814_v21 = vadd.f32 %v813_v20, %v812_v19 }
 0x1e3   : > { %1992 = vmatmul.mubr.f32.vlgmr.msra.gmra.mxu1 %v814_v21  ;;  %v1212_v21 = vld [vmem:[#allocation10 + $0x170] sm:$0xff] }
 0x1e4   : > { %2030 = vmatpush3.msra.mxu1 %v1044_v39  ;;  %v1198_v39 = vld [vmem:[#allocation10 + $0x100] sm:$0xff] }
 0x1e5   : > { %2031 = vmatprep.subr.mxu1 %v1043_v40 }
 0x1e6   : > { %2032 = vmatpush3.msra.mxu1 %v1043_v40 }
 0x1e7   : > { %2033 = vmatprep.subr.mxu1 %v1042_v41 }
 0x1e8   : > { %2034 = vmatpush3.msra.mxu1 %v1042_v41  ;;  %v1328_v41 = vld [vmem:[#allocation12 + $0x78] sm:$0xff] }
 0x1e9   : > { %2035 = vmatprep.subr.mxu1 %v1041_v42 }
 0x1ea   : > { %2036 = vmatpush3.msra.mxu1 %v1041_v42  ;;  %v1327_v42 = vld [vmem:[#allocation12 + $0x70] sm:$0xff] }
 0x1eb   : > { %2037 = vmatprep.subr.mxu1 %v1040_v43 }
 0x1ec   : > { %2038 = vmatpush3.msra.mxu1 %v1040_v43  ;;  %v1326_v43 = vld [vmem:[#allocation12 + $0x68] sm:$0xff] }
 0x1ed   : > { %2039 = vmatprep.subr.mxu1 %v1039_v45 }
 0x1ee   : > { %2040 = vmatpush3.msra.mxu1 %v1039_v45  ;;  %v1324_v45 = vld [vmem:[#allocation12 + $0x58] sm:$0xff] }
 0x1ef   : > { %2041 = vmatprep.subr.mxu1 %v1038_v47 }
 0x1f0   : > { %2042 = vmatpush3.msra.mxu1 %v1038_v47  ;;  %v1322_v47 = vld [vmem:[#allocation12 + $0x48] sm:$0xff] }
 0x1f1   : > { %2043 = vmatprep.subr.mxu1 %v1037_v49 }
 0x1f2   : > { %2044 = vmatpush3.msra.mxu1 %v1037_v49  ;;  %v1320_v49 = vld [vmem:[#allocation12 + $0x38] sm:$0xff] }
 0x1f3   : > { %2045 = vmatprep.subr.mxu1 %v1036_v51 }
 0x1f4   : > { %2046 = vmatpush3.msra.mxu1 %v1036_v51  ;;  %v1318_v51 = vld [vmem:[#allocation12 + $0x28] sm:$0xff] }
 0x1f5   : > { %2047 = vmatprep.subr.mxu1 %v1035_v53 }
 0x1f6   : > { %2048 = vmatpush3.msra.mxu1 %v1035_v53  ;;  %v1316_v53 = vld [vmem:[#allocation12 + $0x18] sm:$0xff] }
 0x1f7   : > { %2049 = vmatprep.subr.mxu1 %v1034_v55 }
 0x1f8   : > { %2050 = vmatpush3.msra.mxu1 %v1034_v55  ;;  %v1314_v55 = vld [vmem:[#allocation12 + $0x8] sm:$0xff] }
 0x1f9   : > { %2051 = vmatprep.subr.mxu1 %v1033_v57 }
 0x1fa   : > { %2052 = vmatpush3.msra.mxu1 %v1033_v57 }
 0x1fb   : > { %2053 = vmatprep.subr.mxu1 %v1032_v59 }
 0x1fc   : > { %2054 = vmatpush3.msra.mxu1 %v1032_v59 }
 0x1fd   : > { %2055 = vmatprep.subr.mxu1 %v1031_v61 }
 0x1fe   : > { %2056 = vmatpush3.msra.mxu1 %v1031_v61 }
 0x1ff   : > { %2057 = vmatprep.subr.mxu1 %v1030_v63 }
 0x200   : > { %2058 = vmatpush3.msra.mxu1 %v1030_v63  ;;  %v1727_v63 = vld [vmem:[%s2999_s7] ss:$0 sm:$0xff] }
 0x201   : > { %2059 = vmatprep.subr.mxu1 %v1029_v2 }
 0x202   : > { %2060 = vmatpush3.msra.mxu1 %v1029_v2 }
 0x203   : > { %2099 = vmatprep.subr.mxu1 %v1213_v4 }
 0x2a3   : > { %v897_v25 = vpop.f32.mrf.mxu1 }
 0x2a4   : > { %v904_v26 = vrot.slane %v897_v25, %v2834_v24  ;;  %v1209_v25 = vld [vmem:[#allocation10 + $0x158] sm:$0xff] }
 0x2a5   : > { %v1993_v27 = vpop.f32.mrf.mxu1 }
 0x2a6   : > { %v2837_v28 = vsub.f32 %v806_v14, %v904_v26  ;;  %v2839_v29 = vsub.f32 %v807_v13, %v904_v26 }
 0x2a8   : > { %v907_v30 = vmul.f32 %v2837_v28, %v2837_v28  ;;  %v908_v31 = vmul.f32 %v2839_v29, %v2839_v29 }
 0x2aa   : > { %v909_v32 = vadd.f32 %v908_v31, %v907_v30  ;;  %v1207_v30 = vld [vmem:[#allocation10 + $0x148] sm:$0xff]  ;;  %v1206_v31 = vld [vmem:[#allocation10 + $0x140] sm:$0xff] }
 0x2ac   : > { %v910_v33 = vrot.slane %v909_v32, 4 }
 0x2ae   : > { %v911_v34 = vadd.f32 %v910_v33, %v909_v32  ;;  %v1205_v32 = vld [vmem:[#allocation10 + $0x138] sm:$0xff]  ;;  %v1204_v33 = vld [vmem:[#allocation10 + $0x130] sm:$0xff] }
 0x2b0   : > { %v912_v35 = vrot.slane %v911_v34, 2 }
 0x2b2   : > { %v913_v36 = vadd.f32 %v912_v35, %v911_v34  ;;  %v1203_v34 = vld [vmem:[#allocation10 + $0x128] sm:$0xff]  ;;  %v1202_v35 = vld [vmem:[#allocation10 + $0x120] sm:$0xff] }
 0x2b4   : > { %v914_v37 = vrot.slane %v913_v36, 1 }
 0x2b6   : > { %v915_v38 = vadd.f32 %v914_v37, %v913_v36  ;;  %v1201_v36 = vld [vmem:[#allocation10 + $0x118] sm:$0xff]  ;;  %v1200_v37 = vld [vmem:[#allocation10 + $0x110] sm:$0xff] }
 0x2b8   : > { %2027 = vmatmul.mubr.f32.vlgmr.msra.gmra.mxu0 %v915_v38  ;;  %v1199_v38 = vld [vmem:[#allocation10 + $0x108] sm:$0xff] }
 0x2b9   : > { %2065 = vmatpush3.msra.mxu0 %v1025_v44  ;;  %v1325_v44 = vld [vmem:[#allocation12 + $0x60] sm:$0xff] }
 0x2ba   : > { %2066 = vmatprep.subr.mxu0 %v1024_v46 }
 0x2bb   : > { %2067 = vmatpush3.msra.mxu0 %v1024_v46  ;;  %v1323_v46 = vld [vmem:[#allocation12 + $0x50] sm:$0xff] }
 0x2bc   : > { %2068 = vmatprep.subr.mxu0 %v1023_v48 }
 0x2bd   : > { %2069 = vmatpush3.msra.mxu0 %v1023_v48  ;;  %v1321_v48 = vld [vmem:[#allocation12 + $0x40] sm:$0xff] }
 0x2be   : > { %2070 = vmatprep.subr.mxu0 %v1022_v50 }
 0x2bf   : > { %2071 = vmatpush3.msra.mxu0 %v1022_v50  ;;  %v1319_v50 = vld [vmem:[#allocation12 + $0x30] sm:$0xff] }
 0x2c0   : > { %2072 = vmatprep.subr.mxu0 %v1021_v52 }
 0x2c1   : > { %2073 = vmatpush3.msra.mxu0 %v1021_v52  ;;  %v1317_v52 = vld [vmem:[#allocation12 + $0x20] sm:$0xff] }
 0x2c2   : > { %2074 = vmatprep.subr.mxu0 %v1020_v54 }
 0x2c3   : > { %2075 = vmatpush3.msra.mxu0 %v1020_v54  ;;  %v1315_v54 = vld [vmem:[#allocation12 + $0x10] sm:$0xff] }
 0x2c4   : > { %2076 = vmatprep.subr.mxu0 %v1019_v56 }
 0x2c5   : > { %2077 = vmatpush3.msra.mxu0 %v1019_v56  ;;  %v1313_v56 = vld [vmem:[#allocation12] sm:$0xff] }
 0x2c6   : > { %2078 = vmatprep.subr.mxu0 %v1018_v58 }
 0x2c7   : > { %2079 = vmatpush3.msra.mxu0 %v1018_v58 }
 0x2c8   : > { %2080 = vmatprep.subr.mxu0 %v1017_v60 }
 0x2c9   : > { %2081 = vmatpush3.msra.mxu0 %v1017_v60 }
 0x2ca   : > { %2082 = vmatprep.subr.mxu0 %v1016_v62 }
 0x2cb   : > { %2083 = vmatpush3.msra.mxu0 %v1016_v62 }
 0x2cc   : > { %2084 = vmatprep.subr.mxu0 %v1015_v1 }
 0x2cd   : > { %2085 = vmatpush3.msra.mxu0 %v1015_v1 }
 0x2ce   : > { %2086 = vmatprep.subr.mxu0 %v1014_v3 }
 0x2cf   : > { %2087 = vmatpush3.msra.mxu0 %v1014_v3 }
 0x2d0   : > { %2088 = vmatprep.subr.mxu0 %v1013_v5 }
 0x2d1   : > { %2089 = vmatpush3.msra.mxu0 %v1013_v5 }
 0x2d2   : > { %2090 = vmatprep.subr.mxu0 %v1012_v6 }
 0x2d3   : > { %2091 = vmatpush3.msra.mxu0 %v1012_v6 }
 0x2d4   : > { %2092 = vmatprep.subr.mxu0 %v1011_v7 }
 0x2d5   : > { %2093 = vmatpush3.msra.mxu0 %v1011_v7 }
 0x2d6   : > { %2094 = vmatprep.subr.mxu0 %v1010_v8 }
 0x2d7   : > { %2095 = vmatpush3.msra.mxu0 %v1010_v8 }
 0x2d8   : > { %2134 = vmatprep.subr.mxu0 %v2521_v0 }
 0x378   : > { %v983_v9 = vpop.f32.mrf.mxu0 }
 0x379   : > { %v984_v10 = vadd.f32 1e-05, %v983_v9 }
 0x37a   : > { %v2028_v11 = vpop.f32.mrf.mxu0 }
 0x37b   : > { %2304 = vrsqrt.f32 %v984_v10 }
 0x388   : > { %v2305_v13 = vpop.eup %2304 }
 0x389   : > { %v988_v14 = vmul.f32 %v2305_v13, %v916_v12 }
 0x38b   : > { %v993_v15 = vrot.slane %v988_v14, %v2834_v24 }
 0x38d   : > { %v995_v17 = vmul.f32 %v993_v15, %v2837_v28  ;;  %v996_v18 = vmul.f32 %v993_v15, %v2839_v29  ;;  %v1208_v29 = vld [vmem:[#allocation10 + $0x150] sm:$0xff] }
 0x38f   : > { %v1004_v19 = vadd.f32 %v1726_v16, %v995_v17  ;;  %v1005_v20 = vadd.f32 %v1726_v16, %v996_v18 }
 0x391   : > { %1006 = vst [vmem:[#allocation3 + $0x1] sm:$0xff] %v1004_v19  ;;  %1007 = vst [vmem:[#allocation3 + $0x9] sm:$0xff] %v1005_v20  ;;  %2061 = vmatprep.mubr.f32.mxu1 %v1004_v19 }
 0x392   : > { %2062 = vmatmul.mubr.f32.vlgmr.msra.gmra.mxu1 %v1005_v20 }
 0x393   : > { %2100 = vmatpush3.msra.mxu1 %v1213_v4 }
 0x394   : > { %2101 = vmatprep.subr.mxu1 %v1212_v21 }
 0x395   : > { %2102 = vmatpush3.msra.mxu1 %v1212_v21 }
 0x396   : > { %2103 = vmatprep.subr.mxu1 %v1211_v22 }
 0x397   : > { %2104 = vmatpush3.msra.mxu1 %v1211_v22 }
 0x398   : > { %v1008_v26 = vld [vmem:[#allocation3] sm:$0xff]  ;;  %v1009_v27 = vld [vmem:[#allocation3 + $0x8] sm:$0xff]  ;;  %2105 = vmatprep.subr.mxu1 %v1210_v23 }
 0x399   : > { %v1195_v28 = vld [vmem:[#allocation3 + $0x2] sm:$0xff]  ;;  %2096 = vmatprep.mubr.f32.mxu0 %v1008_v26  ;;  %2106 = vmatpush3.msra.mxu1 %v1210_v23  ;;  %v1196_v40 = vld [vmem:[#allocation3 + $0xa] sm:$0xff] }
 0x39a   : > { %2131 = vmatprep.mubr.f32.mxu1 %v1195_v28  ;;  %2097 = vmatmul.mubr.f32.vlgmr.msra.gmra.mxu0 %v1009_v27 }
 0x39b   : > { %2107 = vmatprep.subr.mxu1 %v1209_v25  ;;  %2166 = vmatprep.mubr.msk.f32.mxu0 %vm2525_vm6, %v2521_v0 }
 0x39c   : > { %2108 = vmatpush3.msra.mxu1 %v1209_v25  ;;  %2135 = vmatpush3.msra.mxu0 %v1328_v41 }
 0x39d   : > { %2109 = vmatprep.subr.mxu1 %v1208_v29  ;;  %2136 = vmatprep.subr.mxu0 %v2521_v0 }
 0x39e   : > { %2110 = vmatpush3.msra.mxu1 %v1208_v29  ;;  %2137 = vmatpush3.msra.mxu0 %v1327_v42 }
 0x39f   : > { %2111 = vmatprep.subr.mxu1 %v1207_v30  ;;  %2138 = vmatprep.subr.mxu0 %v2521_v0 }
 0x3a0   : > { %2112 = vmatpush3.msra.mxu1 %v1207_v30  ;;  %2139 = vmatpush3.msra.mxu0 %v1326_v43 }
 0x3a1   : > { %2113 = vmatprep.subr.mxu1 %v1206_v31  ;;  %2140 = vmatprep.subr.mxu0 %v2521_v0 }
 0x3a2   : > { %2114 = vmatpush3.msra.mxu1 %v1206_v31  ;;  %2141 = vmatpush3.msra.mxu0 %v1325_v44 }
 0x3a3   : > { %2115 = vmatprep.subr.mxu1 %v1205_v32  ;;  %2142 = vmatprep.subr.mxu0 %v2521_v0 }
 0x3a4   : > { %2116 = vmatpush3.msra.mxu1 %v1205_v32  ;;  %2143 = vmatpush3.msra.mxu0 %v1324_v45 }
 0x3a5   : > { %2117 = vmatprep.subr.mxu1 %v1204_v33  ;;  %2144 = vmatprep.subr.mxu0 %v2521_v0 }
 0x3a6   : > { %2118 = vmatpush3.msra.mxu1 %v1204_v33  ;;  %2145 = vmatpush3.msra.mxu0 %v1323_v46 }
 0x3a7   : > { %2119 = vmatprep.subr.mxu1 %v1203_v34  ;;  %2146 = vmatprep.subr.mxu0 %v2521_v0 }
 0x3a8   : > { %2120 = vmatpush3.msra.mxu1 %v1203_v34  ;;  %2147 = vmatpush3.msra.mxu0 %v1322_v47 }
 0x3a9   : > { %2121 = vmatprep.subr.mxu1 %v1202_v35  ;;  %2148 = vmatprep.subr.mxu0 %v2521_v0 }
 0x3aa   : > { %2122 = vmatpush3.msra.mxu1 %v1202_v35  ;;  %2149 = vmatpush3.msra.mxu0 %v1321_v48  ;;  %v1414_v35 = vld [vmem:[%s3000_s8] sm:$0x1] }
 0x3ab   : > { %2123 = vmatprep.subr.mxu1 %v1201_v36  ;;  %2150 = vmatprep.subr.mxu0 %v2521_v0 }
 0x3ac   : > { %2124 = vmatpush3.msra.mxu1 %v1201_v36  ;;  %2151 = vmatpush3.msra.mxu0 %v1320_v49 }
 0x3ad   : > { %2125 = vmatprep.subr.mxu1 %v1200_v37  ;;  %2152 = vmatprep.subr.mxu0 %v2521_v0 }
 0x3ae   : > { %2126 = vmatpush3.msra.mxu1 %v1200_v37  ;;  %2153 = vmatpush3.msra.mxu0 %v1319_v50 }
 0x3af   : > { %2127 = vmatprep.subr.mxu1 %v1199_v38  ;;  %2154 = vmatprep.subr.mxu0 %v2521_v0 }
 0x3b0   : > { %2128 = vmatpush3.msra.mxu1 %v1199_v38  ;;  %2155 = vmatpush3.msra.mxu0 %v1318_v51 }
 0x3b1   : > { %2129 = vmatprep.subr.mxu1 %v1198_v39  ;;  %2156 = vmatprep.subr.mxu0 %v2521_v0 }
 0x3b2   : > { %2130 = vmatpush3.msra.mxu1 %v1198_v39  ;;  %2157 = vmatpush3.msra.mxu0 %v1317_v52  ;;  %v1728_v39 = vld [vmem:[%s3001_s9] ss:$0 sm:$0xff] }
 0x3b3   : > { %2132 = vmatmul.mubr.f32.vlgmr.msra.gmra.mxu1 %v1196_v40  ;;  %2169 = vmatprep.subr.mxu1 %v2521_v0 }
 0x3b4   : > { %2201 = vmatprep.mubr.msk.f32.mxu1 %vm2525_vm6, %v2521_v0  ;;  %2170 = vmatpush3.msra.mxu1 %v1328_v41 }
 0x3b5   : > { %2171 = vmatprep.subr.mxu1 %v2521_v0  ;;  %2158 = vmatprep.subr.mxu0 %v2521_v0 }
 0x3b6   : > { %2172 = vmatpush3.msra.mxu1 %v1327_v42  ;;  %2159 = vmatpush3.msra.mxu0 %v1316_v53 }
 0x3b7   : > { %2173 = vmatprep.subr.mxu1 %v2521_v0  ;;  %2160 = vmatprep.subr.mxu0 %v2521_v0 }
 0x3b8   : > { %2174 = vmatpush3.msra.mxu1 %v1326_v43  ;;  %2161 = vmatpush3.msra.mxu0 %v1315_v54 }
 0x3b9   : > { %2175 = vmatprep.subr.mxu1 %v2521_v0  ;;  %2162 = vmatprep.subr.mxu0 %v2521_v0 }
 0x3ba   : > { %2176 = vmatpush3.msra.mxu1 %v1325_v44  ;;  %2163 = vmatpush3.msra.mxu0 %v1314_v55 }
 0x3bb   : > { %2177 = vmatprep.subr.mxu1 %v2521_v0  ;;  %2164 = vmatprep.subr.mxu0 %v2521_v0 }
 0x3bc   : > { %2178 = vmatpush3.msra.mxu1 %v1324_v45  ;;  %2165 = vmatpush3.msra.mxu0 %v1313_v56 }
 0x3bd   : > { %2179 = vmatprep.subr.mxu1 %v2521_v0 }
 0x3be   : > { %2180 = vmatpush3.msra.mxu1 %v1323_v46 }
 0x3bf   : > { %2181 = vmatprep.subr.mxu1 %v2521_v0 }
 0x3c0   : > { %2182 = vmatpush3.msra.mxu1 %v1322_v47 }
 0x3c1   : > { %2183 = vmatprep.subr.mxu1 %v2521_v0 }
 0x3c2   : > { %2184 = vmatpush3.msra.mxu1 %v1321_v48 }
 0x3c3   : > { %2185 = vmatprep.subr.mxu1 %v2521_v0 }
 0x3c4   : > { %2186 = vmatpush3.msra.mxu1 %v1320_v49 }
 0x3c5   : > { %2187 = vmatprep.subr.mxu1 %v2521_v0 }
 0x3c6   : > { %2188 = vmatpush3.msra.mxu1 %v1319_v50 }
 0x3c7   : > { %2189 = vmatprep.subr.mxu1 %v2521_v0 }
 0x3c8   : > { %2190 = vmatpush3.msra.mxu1 %v1318_v51 }
 0x3c9   : > { %2191 = vmatprep.subr.mxu1 %v2521_v0 }
 0x3ca   : > { %2192 = vmatpush3.msra.mxu1 %v1317_v52 }
 0x3cb   : > { %2193 = vmatprep.subr.mxu1 %v2521_v0 }
 0x3cc   : > { %2194 = vmatpush3.msra.mxu1 %v1316_v53 }
 0x3cd   : > { %2195 = vmatprep.subr.mxu1 %v2521_v0 }
 0x3ce   : > { %2196 = vmatpush3.msra.mxu1 %v1315_v54 }
 0x3cf   : > { %2197 = vmatprep.subr.mxu1 %v2521_v0 }
 0x3d0   : > { %2198 = vmatpush3.msra.mxu1 %v1314_v55 }
 0x3d1   : > { %2199 = vmatprep.subr.mxu1 %v2521_v0 }
 0x3d2   : > { %2200 = vmatpush3.msra.mxu1 %v1313_v56 }
 0x452   : > { %v2063_v57 = vpop.f32.mrf.mxu1 }
 0x454   : > { %v1111_v59 = vpop.f32.mrf.mxu1 }
 0x45a   : > { %v2098_v58 = vpop.f32.mrf.mxu0 }
 0x45b   : > { %v1192_v61 = vadd.f32 %v2098_v58, %v2063_v57 }
 0x45c   : > { %v1186_v60 = vpop.f32.mrf.mxu0 }
 0x45d   : > { %v1187_v1 = vadd.f32 %v1186_v60, %v1111_v59 }
 0x473   : > { %v2133_v62 = vpop.f32.mrf.mxu1 }
 0x474   : > { %v1290_v2 = vadd.f32 %v2133_v62, %v1192_v61 }
 0x475   : > { %v1280_v3 = vpop.f32.mrf.mxu1 }
 0x476   : > { %v1299_v4 = vadd.f32 %v1727_v63, %v1290_v2  ;;  %v1289_v5 = vadd.f32 %v1280_v3, %v1187_v1 }
 0x478   : > { %v1303_v6 = vmul.f32 0.01, %v1299_v4  ;;  %v1298_v7 = vadd.f32 %v1727_v63, %v1289_v5  ;;  %vm1301_vm9 = vcmp.ge.f32.partialorder %v1299_v4, 0.0 }
 0x47a   : > { %vm1300_vm10 = vcmp.ge.f32.partialorder %v1298_v7, 0.0  ;;  %v1302_v0 = vmul.f32 0.01, %v1298_v7  ;;  %v1305_v8 = vsel %vm1301_vm9, %v1299_v4, %v1303_v6 }
 0x47c   : > { %v1304_v9 = vsel %vm1300_vm10, %v1298_v7, %v1302_v0 }
 0x47d   : > { %v1306_v10 = vadd.f32 %v1305_v8, %v1304_v9 }
 0x47f   : > { %v1307_v11 = vrot.slane %v1306_v10, 4 }
 0x481   : > { %v1308_v12 = vadd.f32 %v1307_v11, %v1306_v10 }
 0x483   : > { %v1309_v13 = vrot.slane %v1308_v12, 2 }
 0x485   : > { %v1310_v14 = vadd.f32 %v1309_v13, %v1308_v12 }
 0x487   : > { %v1311_v15 = vrot.slane %v1310_v14, 1 }
 0x489   : > { %v1312_v16 = vadd.f32 %v1311_v15, %v1310_v14 }
 0x48b   : > { %2167 = vmatmul.mubr.f32.vlgmr.msra.gmra.mxu0 %v1312_v16 }
 0x54b   : > { %v1395_v17 = vpop.f32.mrf.mxu0 }
 0x54c   : > { %v1402_v18 = vrot.slane %v1395_v17, %v2834_v24 }
 0x54d   : > { %v2168_v19 = vpop.f32.mrf.mxu0 }
 0x54e   : > { %v1403_v20 = vsub.f32 %v1304_v9, %v1402_v18  ;;  %v1404_v21 = vsub.f32 %v1305_v8, %v1402_v18 }
 0x550   : > { %v1405_v22 = vmul.f32 %v1403_v20, %v1403_v20  ;;  %v1406_v23 = vmul.f32 %v1404_v21, %v1404_v21 }
 0x552   : > { %v1407_v25 = vadd.f32 %v1406_v23, %v1405_v22 }
 0x554   : > { %v1408_v26 = vrot.slane %v1407_v25, 4 }
 0x556   : > { %v1409_v27 = vadd.f32 %v1408_v26, %v1407_v25 }
 0x558   : > { %v1410_v28 = vrot.slane %v1409_v27, 2 }
 0x55a   : > { %v1411_v29 = vadd.f32 %v1410_v28, %v1409_v27 }
 0x55c   : > { %v1412_v30 = vrot.slane %v1411_v29, 1 }
 0x55e   : > { %v1413_v31 = vadd.f32 %v1412_v30, %v1411_v29 }
 0x560   : > { %2202 = vmatmul.mubr.f32.vlgmr.msra.gmra.mxu1 %v1413_v31 }
 0x620   : > { %v1481_v32 = vpop.f32.mrf.mxu1 }
 0x621   : > { %v1482_v33 = vadd.f32 1e-05, %v1481_v32 }
 0x622   : > { %v2203_v34 = vpop.f32.mrf.mxu1 }
 0x623   : > { %2306 = vrsqrt.f32 %v1482_v33 }
 0x630   : > { %v2307_v36 = vpop.eup %2306 }
 0x631   : > { %v1486_v37 = vmul.f32 %v2307_v36, %v1414_v35 }
 0x633   : > { %v1491_v38 = vrot.slane %v1486_v37, %v2834_v24 }
 0x635   : > { %v1493_v40 = vmul.f32 %v1491_v38, %v1403_v20  ;;  %v1494_v41 = vmul.f32 %v1491_v38, %v1404_v21 }
 0x637   : > { %v1502_v42 = vadd.f32 %v1728_v39, %v1493_v40  ;;  %v1503_v43 = vadd.f32 %v1728_v39, %v1494_v41 }
 0x639   : > { %1504 = vst.msk [vmem:[%s2902_s28] sm:$0xff] %vm470_vm1, %v1502_v42  ;;  %1505 = vst.msk [vmem:[%s2902_s28 + $0x8] sm:$0xff] %vm470_vm1, %v1503_v43  ;;  %1510 = vrot.lane.b32.xlu1 %v1503_v43, %s2526_s22  ;;  %1508 = vrot.lane.b32.xlu0 %v1502_v42, %s2526_s22 }
 0x63d   : > { %1519 = vrot.lane.b32.xlu1 %v1503_v43, %s2527_s12  ;;  %1517 = vrot.lane.b32.xlu0 %v1502_v42, %s2527_s12 }
 0x641   : > { %1528 = vrot.lane.b32.xlu1 %v1503_v43, %s2528_s15  ;;  %1526 = vrot.lane.b32.xlu0 %v1502_v42, %s2528_s15 }
 0x645   : > { %1537 = vrot.lane.b32.xlu1 %v1503_v43, %s2529_s6  ;;  %1535 = vrot.lane.b32.xlu0 %v1502_v42, %s2529_s6 }
 0x649   : > { %1546 = vrot.lane.b32.xlu1 %v1503_v43, %s2524_s23  ;;  %1544 = vrot.lane.b32.xlu0 %v1502_v42, %s2524_s23 }
 0x64d   : > { %1555 = vrot.lane.b32.xlu1 %v1503_v43, %s2522_s1  ;;  %1553 = vrot.lane.b32.xlu0 %v1502_v42, %s2522_s1  ;;  %s1749_s1 = sshll.u32 %s2614_s21, 11  ;;  %s1572_s21 = scalar_lea.sflag [#allocation6], %s2751_s10 }
 0x64e   : > { %s2943_s30 = scalar_lea.hbm %s3003_s11, %s1749_s1 }
 0x651   : > { %1564 = vrot.lane.b32.xlu1 %v1503_v43, %s2523_s5  ;;  %1562 = vrot.lane.b32.xlu0 %v1502_v42, %s2523_s5  ;;  %s1585_s5 = sshll.u32 %s2902_s28, 4  ;;  %s2945_s5 = int_to_ptr.vmem [resolvable:$true] %s1585_s5 }
 0x652   : > { %s2440_s13 = scalar_lea.vmem %s2945_s5, 2048  ;;  %p2447_p13 = scmp.lt.s32.totalorder %s2945_s5, %s2445_s25 }
 0x653   : > { %p2441_p10 = scmp.ne.s32.totalorder %s2945_s5, %s2440_s13  ;;  %p2448_p0 = scmp.lt.s32.totalorder %s2446_s16, %s2440_s13 }
 0x655   : > { %p2442_p7 = pnand %p2441_p10, %p3033_p12  ;;  %p2449_p11 = por %p2448_p0, %p2447_p13 }
 0x657   : > { %p2443_p1 = pneg %p2442_p7 }
 0x659   : > { %p2450_p5 = pnand %p2449_p11, %p2443_p1 }
 0x6ab   : > { %v1511_v24 = vpop.permute.xlu1 %1510  ;;  %v1509_v44 = vpop.permute.xlu0 %1508 }
 0x6ac   : > { %1730 = vst.msk [vmem:[%s2902_s28 + $0x18] sm:$0xff] %vm470_vm1, %v1511_v24  ;;  %1729 = vst.msk [vmem:[%s2902_s28 + $0x10] sm:$0xff] %vm470_vm1, %v1509_v44 }
 0x6af   : > { %v1520_v45 = vpop.permute.xlu1 %1519  ;;  %v1518_v46 = vpop.permute.xlu0 %1517 }
 0x6b0   : > { %1732 = vst.msk [vmem:[%s2902_s28 + $0x28] sm:$0xff] %vm470_vm1, %v1520_v45  ;;  %1731 = vst.msk [vmem:[%s2902_s28 + $0x20] sm:$0xff] %vm470_vm1, %v1518_v46 }
 0x6b3   : > { %v1529_v47 = vpop.permute.xlu1 %1528  ;;  %v1527_v48 = vpop.permute.xlu0 %1526 }
 0x6b4   : > { %1734 = vst.msk [vmem:[%s2902_s28 + $0x38] sm:$0xff] %vm470_vm1, %v1529_v47  ;;  %1733 = vst.msk [vmem:[%s2902_s28 + $0x30] sm:$0xff] %vm470_vm1, %v1527_v48 }
 0x6b7   : > { %v1538_v49 = vpop.permute.xlu1 %1537  ;;  %v1536_v50 = vpop.permute.xlu0 %1535 }
 0x6b8   : > { %1736 = vst.msk [vmem:[%s2902_s28 + $0x48] sm:$0xff] %vm470_vm1, %v1538_v49  ;;  %1735 = vst.msk [vmem:[%s2902_s28 + $0x40] sm:$0xff] %vm470_vm1, %v1536_v50 }
 0x6bb   : > { %v1547_v51 = vpop.permute.xlu1 %1546  ;;  %v1545_v52 = vpop.permute.xlu0 %1544 }
 0x6bc   : > { %1738 = vst.msk [vmem:[%s2902_s28 + $0x58] sm:$0xff] %vm470_vm1, %v1547_v51  ;;  %1737 = vst.msk [vmem:[%s2902_s28 + $0x50] sm:$0xff] %vm470_vm1, %v1545_v52 }
 0x6bf   : > { %v1556_v53 = vpop.permute.xlu1 %1555  ;;  %v1554_v54 = vpop.permute.xlu0 %1553 }
 0x6c0   : > { %1740 = vst.msk [vmem:[%s2902_s28 + $0x68] sm:$0xff] %vm470_vm1, %v1556_v53  ;;  %1739 = vst.msk [vmem:[%s2902_s28 + $0x60] sm:$0xff] %vm470_vm1, %v1554_v54 }
 0x6c3   : > { %v1565_v55 = vpop.permute.xlu1 %1564  ;;  %v1563_v56 = vpop.permute.xlu0 %1562 }
 0x6c4   : > { %1742 = vst.msk [vmem:[%s2902_s28 + $0x78] sm:$0xff] %vm470_vm1, %v1565_v55  ;;  %1741 = vst.msk [vmem:[%s2902_s28 + $0x70] sm:$0xff] %vm470_vm1, %v1563_v56 }
 0x6c5   : > { %2453 = shalt.err (!%p2450_p5)
}
 0x6c6   : > { %s2454_s28 = scalar_lea.hbm %s2943_s30, 2048  ;;  %s2458_s15 = scalar_lea.hbm %s3003_s11, 4096 }
 0x6c7   : > { %p2455_p6 = scmp.ne.s32.totalorder %s2943_s30, %s2454_s28  ;;  %p2459_p9 = scmp.lt.s32.totalorder %s2943_s30, %s3003_s11 }
 0x6c8   : > { %p2460_p2 = scmp.lt.s32.totalorder %s2458_s15, %s2454_s28 }
 0x6c9   : > { %p2456_p4 = pnand %p2455_p6, %p3033_p12 }
 0x6ca   : > { %p2461_p3 = por %p2460_p2, %p2459_p9 }
 0x6cb   : > { %p2457_p8 = pneg %p2456_p4 }
 0x6cd   : > { %p2462_p10 = pnand %p2461_p3, %p2457_p8 }
 0x6cf   : > { %2465 = shalt.err (!%p2462_p10)
}
 0x6d0   : > { %s2531_s23 = smov 128   ;;  %s2532_s29 = smov 8  }
 0x6d1   : > { %2222 = dma.vmem_to_hbm [thread:$0]  (%p3033_p12), %s2945_s5, 2048, %s2943_s30, %s1572_s21, %s2531_s23, %s2531_s23, %s2532_s29  }
 0x6d2 PF: > { %s1600_s13 = sand.u32 1, %s2500_s17   ;;  %p3034_p7 = scmp.ne.s32.totalorder %s3015_s24, 0 }
 0x6d3   : > { %p3035_p1 = scmp.ge.s32.totalorder %s2512_s20, 2  ;;  %s1601_s14 = scalar_lea.sflag [#allocation6], %s1600_s13 }
 0x6d5   : > { %p2242_p13 = pnand %p3035_p1, %p3034_p7 }
 0x6d7   : > { %p2243_p0 = pneg %p2242_p13 }
 0x6d9   : > { %2495 = dma.done.wait (%p2243_p0), %s1601_s14, 2048  }
 0x6da   : > { %2497 = vsyncadd (%p2243_p0), %s1601_s14, 4294965248  ;;  %s3036_s25 = sld [smem:[#allocation18_spill]]  ;;  %p26_p11 = scmp.ge.s32.totalorder %s2693_s27, 4  }
 0x6db   : > { %s3037_s17 = smov %s2504_s18  ;;  %s3038_s18 = smov %s2508_s19 }
 0x6dc   : > { %s3040_s20 = smov %s2693_s27  ;;  %28 = sbr.rel (!%p26_p11) target bundleno = 12 (0xc), region = 139 }
 0x6e0   : > { %s3039_s19 = smov %s3036_s25 }
 0x6e1   :  { %1606 = vsyncpa [#allocation5], 1 }
 0x6e2   :  { %1608 = vsyncpa [#allocation5 + $0x1], 1 }
 0x6e3   :  { %1609 = vsyncpa [#allocation8], 1 }
 0x6e4   :  { %1610 = vsyncpa [#allocation11], 1 }
 0x6e5   :  { %1611 = vsyncpa [#allocation6], 1 }
 0x6e6   :  { %1613 = vsyncpa [#allocation6 + $0x1], 1 }

</bundles_post_ra>
